<compile_context>
chip_gen: v6e
topology: v6e:2x2x1
jax: 0.10.0
libtpu: 0.0.40
codegen_flags: <defaults>
</compile_context>

<pallas_src>
import functools
import math

import jax
import jax.numpy as jnp
from jax import lax
from jax.experimental import pallas as pl
from jax.experimental.pallas import tpu as pltpu


def _prenorm_attention_kernel(x_ref, gamma_ref, beta_ref, wqkv_ref, bqkv_ref,
                              wo_ref, bo_ref, o_ref, *, heads, causal):
    n, d = x_ref.shape
    dh = d // heads

    # ---- PreNorm: LayerNorm(dim) in f32 ------------------------------------
    x = x_ref[...]                                            # (n, d) f32
    mu = jnp.mean(x, axis=-1, keepdims=True)
    xc = x - mu
    var = jnp.mean(xc * xc, axis=-1, keepdims=True)
    xn = xc * lax.rsqrt(var + jnp.float32(1e-5)) * gamma_ref[0] + beta_ref[0]

    # ---- Fused QKV projection (bf16 MXU inputs, f32 accumulation) ----------
    xn_b = xn.astype(jnp.bfloat16)
    qkv = jnp.dot(xn_b, wqkv_ref[...],
                  preferred_element_type=jnp.float32) + bqkv_ref[0]   # (n, 3d) f32
    q = qkv[:, :d]              # attention scale already folded into Wq/bq columns
    k = qkv[:, d:2 * d]
    v = qkv[:, 2 * d:]

    # ---- Batched multi-head attention (single contraction over all heads) --
    split = lambda t: jnp.transpose(t.reshape(n, heads, dh), (1, 0, 2)).astype(jnp.bfloat16)
    qh, kh, vh = split(q), split(k), split(v)                 # (heads, n, dh) bf16

    dots = jnp.einsum('hqd,hkd->hqk', qh, kh,
                      preferred_element_type=jnp.float32)      # (heads, n, n) f32

    if causal:
        row = lax.broadcasted_iota(jnp.int32, (n, n), 0)
        col = lax.broadcasted_iota(jnp.int32, (n, n), 1)
        neg_big = jnp.float32(-jnp.finfo(jnp.float32).max)
        dots = jnp.where((col > row)[None, :, :], neg_big, dots)

    m = jnp.max(dots, axis=-1, keepdims=True)
    e = jnp.exp(dots - m)
    attn = e * pl.reciprocal(jnp.sum(e, axis=-1, keepdims=True), approx=True)

    ctx = jnp.einsum('hqk,hkd->hqd', attn.astype(jnp.bfloat16), vh,
                     preferred_element_type=jnp.float32)       # (heads, n, dh) f32
    out = jnp.transpose(ctx, (1, 0, 2)).reshape(n, d)          # 'h n d -> n (h d)'

    # ---- Output projection ---------------------------------------------------
    y = jnp.dot(out.astype(jnp.bfloat16), wo_ref[...],
                preferred_element_type=jnp.float32) + bo_ref[0]
    o_ref[...] = y.astype(o_ref.dtype)


def prenorm_attention_forward(x, params, *, heads, causal=False):
    """x: (b, n, d) float32.  params: dict of (in, out) weights / (1, out) biases."""
    b, n, d = x.shape
    assert d % heads == 0, "heads must divide dim"
    dh = d // heads
    scale = dh ** (-0.5)

    # Fuse q & kv projections; fold the attention scale into the q columns.
    # Weights -> bf16 for the MXU; biases & LayerNorm params stay f32.
    wqkv = jnp.concatenate([params["wq"] * scale, params["wkv"]], axis=1).astype(jnp.bfloat16)
    bqkv = jnp.concatenate([params["bq"] * scale, params["bkv"]], axis=1).astype(jnp.float32)
    wo = params["wo"].astype(jnp.bfloat16)
    bo = params["bo"].astype(jnp.float32)
    gamma = params["gamma"].astype(jnp.float32)
    beta = params["beta"].astype(jnp.float32)

    kernel = functools.partial(_prenorm_attention_kernel, heads=heads, causal=causal)

    grid_spec = pltpu.PrefetchScalarGridSpec(
        num_scalar_prefetch=0,
        grid=(b,),
        in_specs=[
            pl.BlockSpec((pl.Squeezed(), n, d), lambda i: (i, 0, 0)),   # x: one batch elem
            pl.BlockSpec((1, d), lambda i: (0, 0)),                     # LN gamma
            pl.BlockSpec((1, d), lambda i: (0, 0)),                     # LN beta
            pl.BlockSpec((d, 3 * d), lambda i: (0, 0)),                 # fused Wqkv (bf16)
            pl.BlockSpec((1, 3 * d), lambda i: (0, 0)),                 # fused bqkv
            pl.BlockSpec((d, d), lambda i: (0, 0)),                     # Wo (bf16)
            pl.BlockSpec((1, d), lambda i: (0, 0)),                     # bo
        ],
        out_specs=pl.BlockSpec((pl.Squeezed(), n, d), lambda i: (i, 0, 0)),
    )

    return pl.pallas_call(
        kernel,
        out_shape=jax.ShapeDtypeStruct((b, n, d), x.dtype),
        grid_spec=grid_spec,
        compiler_params=pltpu.CompilerParams(
            dimension_semantics=("parallel",)),
    )(x, gamma, beta, wqkv, bqkv, wo, bo)


def init_params(key, dim):
    """Deterministic init mimicking nn.Linear's uniform(-1/sqrt(in), 1/sqrt(in)).
    Weights already transposed to (in, out); biases as (1, out).  LayerNorm affine
    params are perturbed away from (1, 0) so the affine path is actually exercised."""
    ks = jax.random.split(key, 8)
    bound = 1.0 / math.sqrt(dim)
    u = lambda k, shape, b=bound: jax.random.uniform(k, shape, jnp.float32, -b, b)
    return {
        "gamma": 1.0 + 0.1 * u(ks[0], (1, dim), 1.0),
        "beta":  0.1 * u(ks[1], (1, dim), 1.0),
        "wq":   u(ks[2], (dim, dim)),
        "bq":   u(ks[3], (1, dim)),
        "wkv":  u(ks[4], (dim, 2 * dim)),
        "bkv":  u(ks[5], (1, 2 * dim)),
        "wo":   u(ks[6], (dim, dim)),
        "bo":   u(ks[7], (1, dim)),
    }


def reference_forward(x, params, *, heads, causal=False):
    """Pure-JAX f32 reference mirroring PreNorm(LayerNorm) -> Attention (default path)."""
    b, n, d = x.shape
    dh = d // heads
    scale = dh ** (-0.5)
    mu = x.mean(-1, keepdims=True)
    var = ((x - mu) ** 2).mean(-1, keepdims=True)
    xn = (x - mu) / jnp.sqrt(var + 1e-5) * params["gamma"][0] + params["beta"][0]
    q = xn @ params["wq"] + params["bq"][0]
    kv = xn @ params["wkv"] + params["bkv"][0]
    k, v = kv[..., :d], kv[..., d:]
    reh = lambda t: jnp.transpose(t.reshape(b, n, heads, dh), (0, 2, 1, 3))
    qh, kh, vh = reh(q), reh(k), reh(v)
    dots = jnp.einsum('bhid,bhjd->bhij', qh, kh) * scale
    if causal:
        cm = jnp.triu(jnp.ones((n, n), bool), 1)
        dots = jnp.where(cm, -jnp.finfo(dots.dtype).max, dots)
    attn = jax.nn.softmax(dots, axis=-1)
    out = jnp.einsum('bhij,bhjd->bhid', attn, vh)
    out = jnp.transpose(out, (0, 2, 1, 3)).reshape(b, n, d)
    return out @ params["wo"] + params["bo"][0]


if __name__ == "__main__":
    # Lane-dense hidden dim (multiple of 128), sublane-aligned seq (multiple of 8).
    B, N, DIM, HEADS = 2, 8, 128, 8

    key = jax.random.PRNGKey(0)
    kx, kp = jax.random.split(key)
    x = jax.random.normal(kx, (B, N, DIM), jnp.float32)
    params = init_params(kp, DIM)

    out = prenorm_attention_forward(x, params, heads=HEADS, causal=False)
    out = jax.block_until_ready(out)

    ref = reference_forward(x, params, heads=HEADS, causal=False)
    assert out.shape == (B, N, DIM)
    max_err = float(jnp.max(jnp.abs(out - ref)))
    # bf16 MXU inputs + approx reciprocal -> looser tolerance than the f32 reference.
    assert jnp.allclose(out, ref, atol=3e-2, rtol=3e-2), f"mismatch vs reference (max_err={max_err})"

    print("KERNEL_OK")
</pallas_src>

<mosaic_0001>
module attributes {stable_mosaic.version = 11 : i64} {
  func.func @_prenorm_attention_kernel(%arg0: i32, %arg1: memref<1x8x128xf32, #tpu.memory_space<vmem>>, %arg2: memref<1x128xf32, #tpu.memory_space<vmem>>, %arg3: memref<1x128xf32, #tpu.memory_space<vmem>>, %arg4: memref<128x384xbf16, #tpu.memory_space<vmem>>, %arg5: memref<1x384xf32, #tpu.memory_space<vmem>>, %arg6: memref<128x128xbf16, #tpu.memory_space<vmem>>, %arg7: memref<1x128xf32, #tpu.memory_space<vmem>>, %arg8: memref<1x8x128xf32, #tpu.memory_space<vmem>>) attributes {dimension_semantics = [#tpu.dimension_semantics<parallel>], iteration_bounds = array<i64: 2>, scalar_prefetch = 0 : i64, scratch_operands = 0 : i64, tpu.core_type = #tpu.core_type<tc>, window_params = [{transform_indices = @transform_0, window_bounds = array<i64: 1, 8, 128>}, {pipeline_mode = #tpu.pipeline_mode<synchronous>, transform_indices = @transform_1, window_bounds = array<i64: 1, 128>}, {pipeline_mode = #tpu.pipeline_mode<synchronous>, transform_indices = @transform_2, window_bounds = array<i64: 1, 128>}, {pipeline_mode = #tpu.pipeline_mode<synchronous>, transform_indices = @transform_3, window_bounds = array<i64: 128, 384>}, {pipeline_mode = #tpu.pipeline_mode<synchronous>, transform_indices = @transform_4, window_bounds = array<i64: 1, 384>}, {pipeline_mode = #tpu.pipeline_mode<synchronous>, transform_indices = @transform_5, window_bounds = array<i64: 128, 128>}, {pipeline_mode = #tpu.pipeline_mode<synchronous>, transform_indices = @transform_6, window_bounds = array<i64: 1, 128>}, {transform_indices = @transform_7, window_bounds = array<i64: 1, 8, 128>}]} {
    %c0 = arith.constant 0 : index
    %c0_0 = arith.constant 0 : index
    %c0_1 = arith.constant 0 : index
    %0 = vector.load %arg1[%c0, %c0_0, %c0_1] : memref<1x8x128xf32, #tpu.memory_space<vmem>>, vector<1x8x128xf32>
    %1 = vector.shape_cast %0 : vector<1x8x128xf32> to vector<8x128xf32>
    %cst = arith.constant dense<0.000000e+00> : vector<8xf32>
    %2 = vector.multi_reduction <add>, %1, %cst [1] : vector<8x128xf32> to vector<8xf32>
    %3 = vector.shape_cast %2 : vector<8xf32> to vector<8x1xf32>
    %cst_2 = arith.constant 1.280000e+02 : f32
    %4 = vector.broadcast %cst_2 : f32 to vector<8x1xf32>
    %5 = arith.divf %3, %4 : vector<8x1xf32>
    %6 = vector.broadcast %5 : vector<8x1xf32> to vector<8x128xf32>
    %7 = arith.subf %1, %6 : vector<8x128xf32>
    %8 = arith.mulf %7, %7 : vector<8x128xf32>
    %cst_3 = arith.constant dense<0.000000e+00> : vector<8xf32>
    %9 = vector.multi_reduction <add>, %8, %cst_3 [1] : vector<8x128xf32> to vector<8xf32>
    %10 = vector.shape_cast %9 : vector<8xf32> to vector<8x1xf32>
    %cst_4 = arith.constant 1.280000e+02 : f32
    %11 = vector.broadcast %cst_4 : f32 to vector<8x1xf32>
    %12 = arith.divf %10, %11 : vector<8x1xf32>
    %cst_5 = arith.constant 9.99999974E-6 : f32
    %13 = vector.broadcast %cst_5 : f32 to vector<8x1xf32>
    %14 = arith.addf %12, %13 : vector<8x1xf32>
    %15 = math.rsqrt %14 : vector<8x1xf32>
    %16 = vector.broadcast %15 : vector<8x1xf32> to vector<8x128xf32>
    %17 = arith.mulf %7, %16 : vector<8x128xf32>
    %c0_6 = arith.constant 0 : index
    %c0_7 = arith.constant 0 : index
    %18 = vector.load %arg2[%c0_6, %c0_7] : memref<1x128xf32, #tpu.memory_space<vmem>>, vector<1x128xf32>
    %19 = vector.shape_cast %18 : vector<1x128xf32> to vector<128xf32>
    %20 = vector.shape_cast %19 : vector<128xf32> to vector<1x128xf32>
    %21 = vector.broadcast %20 : vector<1x128xf32> to vector<8x128xf32>
    %22 = arith.mulf %17, %21 : vector<8x128xf32>
    %c0_8 = arith.constant 0 : index
    %c0_9 = arith.constant 0 : index
    %23 = vector.load %arg3[%c0_8, %c0_9] : memref<1x128xf32, #tpu.memory_space<vmem>>, vector<1x128xf32>
    %24 = vector.shape_cast %23 : vector<1x128xf32> to vector<128xf32>
    %25 = vector.shape_cast %24 : vector<128xf32> to vector<1x128xf32>
    %26 = vector.broadcast %25 : vector<1x128xf32> to vector<8x128xf32>
    %27 = arith.addf %22, %26 : vector<8x128xf32>
    %28 = arith.truncf %27 : vector<8x128xf32> to vector<8x128xbf16>
    %c0_10 = arith.constant 0 : index
    %c0_11 = arith.constant 0 : index
    %29 = vector.load %arg4[%c0_10, %c0_11] : memref<128x384xbf16, #tpu.memory_space<vmem>>, vector<128x384xbf16>
    %cst_12 = arith.constant dense<0.000000e+00> : vector<8x384xf32>
    %30 = tpu.matmul %28, %29, %cst_12 {dimension_numbers = #tpu.dot_dimension_numbers<[1], [0], [0], [1], [0, 0, 1, 1], [], []>} : vector<8x128xbf16>, vector<128x384xbf16>, vector<8x384xf32> -> vector<8x384xf32>
    %c0_13 = arith.constant 0 : index
    %c0_14 = arith.constant 0 : index
    %31 = vector.load %arg5[%c0_13, %c0_14] : memref<1x384xf32, #tpu.memory_space<vmem>>, vector<1x384xf32>
    %32 = vector.shape_cast %31 : vector<1x384xf32> to vector<384xf32>
    %33 = vector.shape_cast %32 : vector<384xf32> to vector<1x384xf32>
    %34 = vector.broadcast %33 : vector<1x384xf32> to vector<8x384xf32>
    %35 = arith.addf %30, %34 : vector<8x384xf32>
    %36 = vector.extract_strided_slice %35 {offsets = [0, 0], sizes = [8, 128], strides = [1, 1]} : vector<8x384xf32> to vector<8x128xf32>
    %37 = vector.extract_strided_slice %35 {offsets = [0, 128], sizes = [8, 128], strides = [1, 1]} : vector<8x384xf32> to vector<8x128xf32>
    %38 = vector.extract_strided_slice %35 {offsets = [0, 256], sizes = [8, 128], strides = [1, 1]} : vector<8x384xf32> to vector<8x128xf32>
    %39 = vector.shape_cast %36 : vector<8x128xf32> to vector<8x8x16xf32>
    %40 = tpu.transpose %39, [1, 0, 2] : vector<8x8x16xf32> -> vector<8x8x16xf32>
    %41 = arith.truncf %40 : vector<8x8x16xf32> to vector<8x8x16xbf16>
    %42 = vector.shape_cast %37 : vector<8x128xf32> to vector<8x8x16xf32>
    %43 = tpu.transpose %42, [1, 0, 2] : vector<8x8x16xf32> -> vector<8x8x16xf32>
    %44 = arith.truncf %43 : vector<8x8x16xf32> to vector<8x8x16xbf16>
    %45 = vector.shape_cast %38 : vector<8x128xf32> to vector<8x8x16xf32>
    %46 = tpu.transpose %45, [1, 0, 2] : vector<8x8x16xf32> -> vector<8x8x16xf32>
    %47 = arith.truncf %46 : vector<8x8x16xf32> to vector<8x8x16xbf16>
    "tpu.trace_start"() <{level = 10 : i32, message = "hqd,hkd->hqk"}> : () -> ()
    %cst_15 = arith.constant dense<0.000000e+00> : vector<8x8x8xf32>
    %48 = tpu.matmul %41, %44, %cst_15 {dimension_numbers = #tpu.dot_dimension_numbers<[2], [2], [1], [1], [0, 0, 0, 1, 1, 1], [0], [0]>} : vector<8x8x16xbf16>, vector<8x8x16xbf16>, vector<8x8x8xf32> -> vector<8x8x8xf32>
    "tpu.trace_stop"() : () -> ()
    %cst_16 = arith.constant dense<0xFF800000> : vector<8x8xf32>
    %49 = vector.multi_reduction <maximumf>, %48, %cst_16 [2] : vector<8x8x8xf32> to vector<8x8xf32>
    %50 = vector.shape_cast %49 : vector<8x8xf32> to vector<8x8x1xf32>
    %51 = vector.broadcast %50 : vector<8x8x1xf32> to vector<8x8x8xf32>
    %52 = arith.subf %48, %51 : vector<8x8x8xf32>
    %53 = math.exp %52 : vector<8x8x8xf32>
    %cst_17 = arith.constant dense<0.000000e+00> : vector<8x8xf32>
    %54 = vector.multi_reduction <add>, %53, %cst_17 [2] : vector<8x8x8xf32> to vector<8x8xf32>
    %55 = vector.shape_cast %54 : vector<8x8xf32> to vector<8x8x1xf32>
    %56 = tpu.reciprocal %55 {approx = true} : vector<8x8x1xf32> -> vector<8x8x1xf32>
    %57 = vector.broadcast %56 : vector<8x8x1xf32> to vector<8x8x8xf32>
    %58 = arith.mulf %53, %57 : vector<8x8x8xf32>
    %59 = arith.truncf %58 : vector<8x8x8xf32> to vector<8x8x8xbf16>
    "tpu.trace_start"() <{level = 10 : i32, message = "hqk,hkd->hqd"}> : () -> ()
    %cst_18 = arith.constant dense<0.000000e+00> : vector<8x8x16xf32>
    %60 = tpu.matmul %59, %47, %cst_18 {dimension_numbers = #tpu.dot_dimension_numbers<[2], [1], [1], [2], [0, 0, 0, 1, 1, 2], [0], [0]>} : vector<8x8x8xbf16>, vector<8x8x16xbf16>, vector<8x8x16xf32> -> vector<8x8x16xf32>
    "tpu.trace_stop"() : () -> ()
    %61 = tpu.transpose %60, [1, 0, 2] : vector<8x8x16xf32> -> vector<8x8x16xf32>
    %62 = vector.shape_cast %61 : vector<8x8x16xf32> to vector<8x128xf32>
    %63 = arith.truncf %62 : vector<8x128xf32> to vector<8x128xbf16>
    %c0_19 = arith.constant 0 : index
    %c0_20 = arith.constant 0 : index
    %64 = vector.load %arg6[%c0_19, %c0_20] : memref<128x128xbf16, #tpu.memory_space<vmem>>, vector<128x128xbf16>
    %cst_21 = arith.constant dense<0.000000e+00> : vector<8x128xf32>
    %65 = tpu.matmul %63, %64, %cst_21 {dimension_numbers = #tpu.dot_dimension_numbers<[1], [0], [0], [1], [0, 0, 1, 1], [], []>} : vector<8x128xbf16>, vector<128x128xbf16>, vector<8x128xf32> -> vector<8x128xf32>
    %c0_22 = arith.constant 0 : index
    %c0_23 = arith.constant 0 : index
    %66 = vector.load %arg7[%c0_22, %c0_23] : memref<1x128xf32, #tpu.memory_space<vmem>>, vector<1x128xf32>
    %67 = vector.shape_cast %66 : vector<1x128xf32> to vector<128xf32>
    %68 = vector.shape_cast %67 : vector<128xf32> to vector<1x128xf32>
    %69 = vector.broadcast %68 : vector<1x128xf32> to vector<8x128xf32>
    %70 = arith.addf %65, %69 : vector<8x128xf32>
    %c0_24 = arith.constant 0 : index
    %c0_25 = arith.constant 0 : index
    %c0_26 = arith.constant 0 : index
    %71 = vector.load %arg8[%c0_24, %c0_25, %c0_26] : memref<1x8x128xf32, #tpu.memory_space<vmem>>, vector<1x8x128xf32>
    %72 = vector.shape_cast %71 : vector<1x8x128xf32> to vector<8x128xf32>
    %73 = vector.shape_cast %70 : vector<8x128xf32> to vector<1x8x128xf32>
    tpu.vector_store %arg8[%c0_24, %c0_25, %c0_26], %73 {strides = array<i32>} : memref<1x8x128xf32, #tpu.memory_space<vmem>>, vector<1x8x128xf32>,
    return
  }
  func.func @transform_0(%arg0: i32) -> (i32, i32, i32) {
    %c0_i32 = arith.constant 0 : i32
    %c0_i32_0 = arith.constant 0 : i32
    %c0_i32_1 = arith.constant 0 : i32
    return %arg0, %c0_i32, %c0_i32_0 : i32, i32, i32
  }
  func.func @transform_1(%arg0: i32) -> (i32, i32) {
    %c0_i32 = arith.constant 0 : i32
    %c0_i32_0 = arith.constant 0 : i32
    %c0_i32_1 = arith.constant 0 : i32
    return %c0_i32, %c0_i32_0 : i32, i32
  }
  func.func @transform_2(%arg0: i32) -> (i32, i32) {
    %c0_i32 = arith.constant 0 : i32
    %c0_i32_0 = arith.constant 0 : i32
    %c0_i32_1 = arith.constant 0 : i32
    return %c0_i32, %c0_i32_0 : i32, i32
  }
  func.func @transform_3(%arg0: i32) -> (i32, i32) {
    %c0_i32 = arith.constant 0 : i32
    %c0_i32_0 = arith.constant 0 : i32
    %c0_i32_1 = arith.constant 0 : i32
    return %c0_i32, %c0_i32_0 : i32, i32
  }
  func.func @transform_4(%arg0: i32) -> (i32, i32) {
    %c0_i32 = arith.constant 0 : i32
    %c0_i32_0 = arith.constant 0 : i32
    %c0_i32_1 = arith.constant 0 : i32
    return %c0_i32, %c0_i32_0 : i32, i32
  }
  func.func @transform_5(%arg0: i32) -> (i32, i32) {
    %c0_i32 = arith.constant 0 : i32
    %c0_i32_0 = arith.constant 0 : i32
    %c0_i32_1 = arith.constant 0 : i32
    return %c0_i32, %c0_i32_0 : i32, i32
  }
  func.func @transform_6(%arg0: i32) -> (i32, i32) {
    %c0_i32 = arith.constant 0 : i32
    %c0_i32_0 = arith.constant 0 : i32
    %c0_i32_1 = arith.constant 0 : i32
    return %c0_i32, %c0_i32_0 : i32, i32
  }
  func.func @transform_7(%arg0: i32) -> (i32, i32, i32) {
    %c0_i32 = arith.constant 0 : i32
    %c0_i32_0 = arith.constant 0 : i32
    %c0_i32_1 = arith.constant 0 : i32
    return %arg0, %c0_i32, %c0_i32_0 : i32, i32, i32
  }
}

</mosaic_0001>

<bundles_post_ra>
// kernel: tpu_custom_call.1
= control target key start
LH: loop header
LB: loop body
LE: loop exit
PB: predicated region body
PF: predicated region fallthrough
CT: control target
= control target key end

     0   :  { %s4112_s0 = inlined_call_operand.hbm [shape: f32[2,8,128], index: 0, kind: input, shape index: {}]   ;;  %s4113_s1 = inlined_call_operand.vmem [shape: f32[1,128], index: 1, kind: input, shape index: {}]   ;;  %s4114_s2 = inlined_call_operand.vmem [shape: f32[1,128], index: 2, kind: input, shape index: {}]   ;;  %s4115_s3 = inlined_call_operand.hbm [shape: bf16[128,384], index: 3, kind: input, shape index: {}]   ;;  %s4116_s4 = inlined_call_operand.vmem [shape: f32[1,384], index: 4, kind: input, shape index: {}]   ;;  %s4117_s5 = inlined_call_operand.hbm [shape: bf16[128,128], index: 5, kind: input, shape index: {}]   ;;  %s4118_s6 = inlined_call_operand.vmem [shape: f32[1,128], index: 6, kind: input, shape index: {}]   ;;  %s4119_s7 = inlined_call_operand.hbm [shape: f32[2,8,128], index: 7, kind: output, shape index: {}]  }
   0x1   :  { %4124 = sst [smem:[#allocation12_spill]] %s4115_s3 }
   0x2   :  { %4125 = sst [smem:[#allocation13_spill]] %s4117_s5 }
   0x3   :  { %12 = vsyncpa [#allocation3], 0 }
   0x4   :  { %14 = vsyncpa [#allocation3 + $0x1], 0 }
   0x5   :  { %15 = vsyncpa [#allocation6], 0 }
   0x6   :  { %16 = vsyncpa [#allocation4], 0 }
   0x7   :  { %18 = vsyncpa [#allocation4 + $0x1], 0  ;;  %s3534_s24 = smov 0   ;;  %s3536_s25 = smov 0  }
   0x8   :  { %s3538_s26 = smov 0   ;;  %s3540_s27 = smov 0  }
   0x9 LB: > { %s3555_s28 = sadd.s32 4294967295, %s3472_s27   ;;  %s2882_s29 = sadd.s32 4294967294, %s3472_s27   ;;  %s3472_s27 = sphi %s3540_s27, %s4145_s27   ;;  %s3468_s26 = sphi %s3538_s26, %s4144_s26   ;;  %s3464_s25 = sphi %s3536_s25, %s4143_s25   ;;  %s3460_s24 = sphi %s3534_s24, %s4142_s24  }
   0xa   : > { %p44_p0 = scmp.ne.s32.totalorder %s3464_s25, %s3460_s24  ;;  %p4120_p1 = scmp.eq.s32.totalorder %s3555_s28, 0 }
   0xb   : > { %p200_p3 = scmp.eq.s32.totalorder %s2882_s29, 1  ;;  %p2883_p5 = scmp.ge.s32.totalorder %s3472_s27, 1 }
   0xc   : > { %p3564_p4 = por %p4120_p1, %p44_p0  ;;  %p207_p7 = scmp.lt.s32.totalorder %s3472_s27, 3 }
   0xd   : > { %p3569_p6 = por %p200_p3, %p44_p0  ;;  %s3474_s10 = smov [#allocation5]  }
   0xe   : > { %s4126_s30 = scalar_select %p3564_p4, 1, 0 }
   0xf   : > { %s4127_s8 = scalar_select %p3569_p6, 1, 0 }
  0x10   : > { %p3574_p8 = pnand %p2883_p5, %p207_p7  ;;  %s225_s11 = sshll.u32 %s3474_s10, 4  ;;  %s226_s11 = int_to_ptr.vmem [resolvable:$true] %s225_s11 }
  0x11   : > { %s3475_s13 = smov [#allocation7]   ;;  %s3335_s15 = scalar_lea.vmem %s226_s11, 3072 }
  0x12   : > { %s4128_s9 = scalar_select %p3574_p8, 1, 0 }
  0x13   : > { %p3179_p9 = pneg %p3574_p8  ;;  %s241_s14 = sshll.u32 %s3475_s13, 4  ;;  %s242_s14 = int_to_ptr.vmem [resolvable:$true] %s241_s14 }
  0x14   : > { %p3336_p13 = scmp.ne.s32.totalorder %s226_s11, %s3335_s15  ;;  %p3343_p5 = scmp.lt.s32.totalorder %s226_s11, %s226_s11 }
  0x15   : > { %p3583_p11 = pnand %p3179_p9, %p4120_p1  ;;  %p3344_p7 = scmp.lt.s32.totalorder %s3335_s15, %s3335_s15 }
  0x17   : > { %p3326_p12 = pneg %p3583_p11  ;;  %p3345_p10 = por %p3344_p7, %p3343_p5 }
  0x19   : > { %p3338_p0 = pnand %p3336_p13, %p3326_p12 }
  0x1b   : > { %p3339_p3 = pneg %p3338_p0 }
  0x1d   : > { %p3346_p9 = pnand %p3345_p10, %p3339_p3 }
  0x1f   : > { %3349 = shalt.err (!%p3346_p9)
}
  0x20   : > { %s3476_s16 = smov 192   ;;  %s3477_s17 = smov 12  }
  0x21   : > { %s4130_s3 = sld [smem:[#allocation12_spill]]  ;;  %s3361_s20 = scalar_lea.vmem %s242_s14, 1024 }
  0x22   : > { %p3362_p1 = scmp.ne.s32.totalorder %s242_s14, %s3361_s20  ;;  %p3369_p2 = scmp.lt.s32.totalorder %s242_s14, %s242_s14 }
  0x23   : > { %p3370_p6 = scmp.lt.s32.totalorder %s3361_s20, %s3361_s20 }
  0x24   : > { %p3364_p13 = pnand %p3362_p1, %p3326_p12 }
  0x25   : > { %p3371_p5 = por %p3370_p6, %p3369_p2 }
  0x26   : > { %p3365_p0 = pneg %p3364_p13 }
  0x27   : > { %3182 = dma.hbm_to_vmem [thread:$0]  (!%p3583_p11), %s4130_s3, 3072, %s226_s11, [#allocation6], %s3476_s16, %s3476_s16, %s3477_s17  }
  0x28   : > { %p3372_p10 = pnand %p3371_p5, %p3365_p0 }
  0x2a   : > { %3375 = shalt.err (!%p3372_p10)
}
  0x2b   : > { %s3478_s21 = smov 64   ;;  %s3479_s22 = smov 4  }
  0x2c   : > { %s4131_s5 = sld [smem:[#allocation13_spill]]  ;;  %s3606_s10 = sadd.s32 1, %s3472_s27  }
  0x2d   : > { %s28_s11 = ssub.s32 %s3472_s27, %s3606_s10  ;;  %s31_s13 = sadd.s32 1, %s3468_s26 }
  0x2e   : > { %p29_p1 = scmp.eq.s32.totalorder %s28_s11, 0  ;;  %p38_p2 = scmp.ne.s32.totalorder %s3468_s26, %s3464_s25 }
  0x2f   : > { %p39_p6 = scmp.eq.s32.totalorder %s3472_s27, 0  ;;  %p4132_p3 = scmp.eq.s32.totalorder %s3555_s28, 1 }
  0x30   : > { %s3615_s15 = scalar_select %p29_p1, %s3468_s26, %s31_s13  }
  0x31   : > { %p40_p12 = por %p39_p6, %p38_p2  ;;  %p3619_p7 = por %p4132_p3, %p38_p2 }
  0x32   : > { %3185 = dma.hbm_to_vmem [thread:$0]  (!%p3583_p11), %s4131_s5, 1024, %s242_s14, [#allocation6], %s3478_s21, %s3478_s21, %s3479_s22  }
  0x33   : > { %s4133_s16 = scalar_select %p3619_p7, 1, 0 }
  0x34   : > { %p3196_p9 = scmp.lt.s32.totalorder %s3472_s27, 2  ;;  %s258_s12 = sand.u32 1, %s3468_s26  }
  0x35   : > { %s2887_s17 = sshll.u32 %s258_s12, 3  ;;  %s2888_s14 = sshll.u32 %s3472_s27, 7 }
  0x36   : > { %s3629_s20 = scalar_lea.hbm %s4112_s0, %s2888_s14  ;;  %s262_s21 = scalar_lea.vmem [#allocation2], %s2887_s17 }
  0x37   : > { %s269_s22 = sshll.u32 %s262_s21, 4  ;;  %p3631_p11 = pnand %p3196_p9, %p40_p12  ;;  %s270_s22 = int_to_ptr.vmem [resolvable:$true] %s269_s22 }
  0x38   : > { %s259_s29 = scalar_lea.sflag [#allocation3], %s258_s12  ;;  %s3376_s11 = scalar_lea.hbm %s3629_s20, 128 }
  0x39   : > { %p3377_p13 = scmp.ne.s32.totalorder %s3629_s20, %s3376_s11  ;;  %p3378_p0 = pneg %p3631_p11 }
  0x3a   : > { %s3381_s18 = scalar_lea.hbm %s4112_s0, 256  ;;  %p3382_p1 = scmp.lt.s32.totalorder %s3629_s20, %s4112_s0 }
  0x3b   : > { %p3379_p5 = pnand %p3378_p0, %p3377_p13  ;;  %p3383_p2 = scmp.lt.s32.totalorder %s3381_s18, %s3376_s11 }
  0x3d   : > { %p3380_p10 = pneg %p3379_p5  ;;  %p3384_p6 = por %p3383_p2, %p3382_p1 }
  0x3f   : > { %p3385_p12 = pnand %p3384_p6, %p3380_p10 }
  0x41   : > { %3388 = shalt.err (!%p3385_p12)
}
  0x42   : > { %s3389_s21 = scalar_lea.vmem %s270_s22, 128  ;;  %s3480_s12 = smov [#allocation2]  }
  0x43   : > { %p3390_p3 = scmp.ne.s32.totalorder %s270_s22, %s3389_s21  ;;  %s3394_s3 = sshll.u32 %s3480_s12, 4  ;;  %s3395_s3 = int_to_ptr.vmem [resolvable:$false] %s3394_s3 }
  0x44   : > { %s3396_s5 = scalar_lea.vmem %s3395_s3, 256  ;;  %p3397_p13 = scmp.lt.s32.totalorder %s270_s22, %s3395_s3 }
  0x45   : > { %p3392_p9 = pnand %p3390_p3, %p3378_p0  ;;  %p3398_p5 = scmp.lt.s32.totalorder %s3396_s5, %s3389_s21 }
  0x47   : > { %p3393_p7 = pneg %p3392_p9  ;;  %p3399_p4 = por %p3398_p5, %p3397_p13 }
  0x49   : > { %p3400_p8 = pnand %p3399_p4, %p3393_p7 }
  0x4b   : > { %3403 = shalt.err (!%p3400_p8)
}
  0x4c   : > { %3189 = dma.hbm_to_vmem [thread:$0]  (!%p3631_p11), %s3629_s20, 128, %s270_s22, %s259_s29  }
  0x4d   : > { %p4135_p10 = scmp.ne.s32.totalorder %s4128_s9, 0 }
  0x4e   : > { %s3652_s11 = sand.u32 (!%p4135_p10), 1, %s3464_s25   ;;  %p4136_p4 = scmp.ne.s32.totalorder (!%p4135_p10), %s4126_s30, 0 }
  0x4f   : > { %278 = sbr.rel (%p4135_p10) target bundleno = 1910 (0x776), region = 48  ;;  %s2890_s13 = sshll.u32 (!%p4135_p10), %s3652_s11, 3 }
  0x50   : > { %s281_s3 = scalar_lea.sflag (!%p4135_p10), [#allocation3], %s3652_s11  ;;  %s284_s5 = scalar_lea.vmem (!%p4135_p10), [#allocation2], %s2890_s13 }
  0x54   : > { %3447 = dma.done.wait (%p4136_p4), %s281_s3, 128  }
  0x55   : > { %3449 = vsyncadd (%p4136_p4), %s281_s3, 4294967168  ;;  %p4137_p8 = scmp.eq.s32.totalorder %s3555_s28, 0 }
  0x57   : > { %3451 = dma.done.wait (%p4137_p8), [#allocation6], 4096   ;;  %p4138_p7 = pmov %p4137_p8 }
  0x58   : > { %v324_v0 = vld [vmem:[%s284_s5] sm:$0xff]  ;;  %v3481_v3 = vmov 0.0   ;;  %v3261_v14 = vld [vmem:[#allocation5 + $0x80] ss:$12 sps:$4 sm:$0xff]   ;;  %v3482_v22 = vmov 0   ;;  %vm3483_vm0 = vmmov 0   ;;  %v388_v41 = vlaneseq }
  0x59   : > { %3453 = vsyncadd (%p4138_p7), [#allocation6], 4294963200  ;;  %325 = vadd.xlane.f32.xlu0 %v324_v0  ;;  %v3250_v1 = vld [vmem:[#allocation5 + $0xac] ss:$12 sps:$4 sm:$0xff]   ;;  %v3252_v2 = vld [vmem:[#allocation5 + $0xa8] ss:$12 sps:$4 sm:$0xff]   ;;  %3031 = vmatprep.subr.bf16.mxu1 %v3481_v3 }
  0x5a   : > { %v3253_v4 = vld [vmem:[#allocation5 + $0xb0] ss:$12 sps:$4 sm:$0xff]   ;;  %v3254_v5 = vld [vmem:[#allocation5 + $0x94] ss:$12 sps:$4 sm:$0xff]   ;;  %531 = vmatprep.subr.bf16.mxu0 %v3250_v1  ;;  %v3257_v7 = vld [vmem:[#allocation5 + $0x98] ss:$12 sps:$4 sm:$0xff]   ;;  %563 = vmatprep.mubr.bf16.mxu0 %v3482_v22 }
  0x5b   : > { %532 = vmatpush1.bf16.msra.mxu0 %v3252_v2  ;;  %3032 = vmatpush3.bf16.msra.mxu1 %v3253_v4  ;;  %v3256_v6 = vld [vmem:[#allocation5 + $0x90] ss:$12 sps:$4 sm:$0xff]   ;;  %v3260_v13 = vld [vmem:[#allocation5 + $0x78] ss:$12 sps:$4 sm:$0xff]   ;;  %v3264_v16 = vld [vmem:[#allocation5 + $0x60] ss:$12 sps:$4 sm:$0xff]  }
  0x5c   : > { %533 = vmatprep.subr.bf16.mxu0 %v3254_v5  ;;  %3033 = vmatprep.subr.bf16.mxu1 %v3481_v3  ;;  %v3258_v12 = vld [vmem:[#allocation5 + $0x7c] ss:$12 sps:$4 sm:$0xff]   ;;  %v3262_v15 = vld [vmem:[#allocation5 + $0x64] ss:$12 sps:$4 sm:$0xff]   ;;  %v3266_v18 = vld [vmem:[#allocation5 + $0x4c] ss:$12 sps:$4 sm:$0xff]  }
  0x5d   : > { %v3265_v17 = vld [vmem:[#allocation5 + $0x68] ss:$12 sps:$4 sm:$0xff]   ;;  %v3269_v20 = vld [vmem:[#allocation5 + $0x50] ss:$12 sps:$4 sm:$0xff]   ;;  %3047 = vmatprep.mubr.msk.bf16.mxu1 %vm3483_vm0, %v3481_v3  ;;  %v3273_v24 = vld [vmem:[#allocation5 + $0x38] ss:$12 sps:$4 sm:$0xff]  }
  0x5e   : > { %v3268_v19 = vld [vmem:[#allocation5 + $0x48] ss:$12 sps:$4 sm:$0xff]   ;;  %v3272_v23 = vld [vmem:[#allocation5 + $0x30] ss:$12 sps:$4 sm:$0xff]   ;;  %v3276_v26 = vld [vmem:[#allocation5 + $0x18] ss:$12 sps:$4 sm:$0xff]  }
  0x5f   : > { %534 = vmatpush1.bf16.msra.mxu0 %v3256_v6  ;;  %3034 = vmatpush3.bf16.msra.mxu1 %v3257_v7  ;;  %v3270_v21 = vld [vmem:[#allocation5 + $0x34] ss:$12 sps:$4 sm:$0xff]   ;;  %v3274_v25 = vld [vmem:[#allocation5 + $0x1c] ss:$12 sps:$4 sm:$0xff]   ;;  %v3278_v28 = vld [vmem:[#allocation5 + $0x4] ss:$12 sps:$4 sm:$0xff]  }
  0x60   : > { %3035 = vmatprep.subr.bf16.mxu1 %v3481_v3  ;;  %535 = vmatprep.subr.bf16.mxu0 %v3258_v12  ;;  %v3277_v27 = vld [vmem:[#allocation5 + $0x20] ss:$12 sps:$4 sm:$0xff]   ;;  %v3281_v30 = vld [vmem:[#allocation5 + $0x8] ss:$12 sps:$4 sm:$0xff]   ;;  %v2894_v35 = vld [vmem:[%s4113_s1] ss:$0 sm:$0xff] }
  0x61   : > { %v3280_v29 = vld [vmem:[#allocation5] ss:$12 sps:$4 sm:$0xff]   ;;  %v2895_v37 = vld [vmem:[%s4114_s2] ss:$0 sm:$0xff]  ;;  %v3688_v42 = vshrl.u32 %v388_v41, 7  ;;  %s3484_s14 = smov 80  }
  0x62   : > { %v3694_v44 = vld [vmem:[%s4116_s4] sm:$0x7]  ;;  %s3485_s18 = smov 112   ;;  %s3486_s19 = smov 16   ;;  %v3491_v58 = vmov 1983009808  }
  0x63   : > { %536 = vmatpush1.bf16.msra.mxu0 %v3260_v13  ;;  %3036 = vmatpush3.bf16.msra.mxu1 %v3261_v14  ;;  %v394_v43 = vsub.s32 1, %v3688_v42  ;;  %v390_v50 = vsub.s32 0, %v3688_v42  ;;  %s3487_s17 = smov 96   ;;  %s3488_s21 = smov 48   ;;  %v637_v59 = vunpack.c.l.s4 %v3491_v58  ;;  %v3492_v60 = vmov 1934713408  }
  0x64   : > { %3037 = vmatprep.subr.bf16.mxu1 %v3481_v3  ;;  %537 = vmatprep.subr.bf16.mxu0 %v3262_v15  ;;  %s3489_s12 = smov 64   ;;  %s3490_s3 = smov 32   ;;  %v701_v61 = vunpack.c.l.s4 %v3492_v60  ;;  %vm1518_vm1 = vcmask 130048   ;;  %vm1887_vm2 = vcmask 64512   ;;  %vm1987_vm3 = vcmask 1043456  }
  0x65   : > { %v395_v45 = vrot.slane %v3694_v44, %v394_v43  ;;  %v391_v56 = vrot.slane %v3694_v44, %v390_v50  ;;  %v638_v62 = vunpack.c.0.s8 %v637_v59  ;;  %vm2654_vm4 = vcmask 261120   ;;  %s2978_s9 = sshll.u32 %s3555_s28, 7  ;;  %s322_s20 = scalar_lea.vmem [#allocation8], %s2890_s13 }
  0x66   : > { %v702_v1 = vunpack.c.0.s8 %v701_v61  ;;  %vm2656_vm5 = vcmask 392192   ;;  %vm2658_vm6 = vcmask 523264   ;;  %vm2660_vm7 = vcmask 654336   ;;  %s2793_s22 = sshll.u32 %s322_s20, 4  ;;  %p4139_p0 = scmp.ne.s32.totalorder %s4133_s16, 0  ;;  %s4071_s22 = int_to_ptr.vmem [resolvable:$true] %s2793_s22 }
  0x67   : > { %538 = vmatpush1.bf16.msra.mxu0 %v3264_v16  ;;  %3038 = vmatpush3.bf16.msra.mxu1 %v3265_v17  ;;  %v3716_v2 = vsub.s32 %v638_v62, %v3688_v42  ;;  %vm2662_vm8 = vcmask 785408   ;;  %vm2664_vm9 = vcmask 916480   ;;  %s3404_s28 = scalar_lea.vmem %s4071_s22, 128  ;;  %s3493_s13 = smov [#allocation8]  }
  0x68   : > { %539 = vmatprep.subr.bf16.mxu0 %v3266_v18  ;;  %3039 = vmatprep.subr.bf16.mxu1 %v3481_v3  ;;  %p3405_p11 = scmp.ne.s32.totalorder %s4071_s22, %s3404_s28 }
  0x6a   : > { %p3406_p1 = pnand %p3405_p11, %p4139_p0 }
  0x6b   : > { %540 = vmatpush1.bf16.msra.mxu0 %v3268_v19  ;;  %3040 = vmatpush3.bf16.msra.mxu1 %v3269_v20 }
  0x6c   : > { %541 = vmatprep.subr.bf16.mxu0 %v3270_v21  ;;  %3041 = vmatprep.subr.bf16.mxu1 %v3481_v3  ;;  %p3407_p2 = pneg %p3406_p1 }
  0x6f   : > { %542 = vmatpush1.bf16.msra.mxu0 %v3272_v23  ;;  %3042 = vmatpush3.bf16.msra.mxu1 %v3273_v24 }
  0x70   : > { %543 = vmatprep.subr.bf16.mxu0 %v3274_v25  ;;  %3043 = vmatprep.subr.bf16.mxu1 %v3481_v3 }
  0x73   : > { %544 = vmatpush1.bf16.msra.mxu0 %v3276_v26  ;;  %3044 = vmatpush3.bf16.msra.mxu1 %v3277_v27 }
  0x74   : > { %545 = vmatprep.subr.bf16.mxu0 %v3278_v28  ;;  %3045 = vmatprep.subr.bf16.mxu1 %v3481_v3 }
  0x77   : > { %546 = vmatpush1.bf16.msra.mxu0 %v3280_v29  ;;  %3046 = vmatpush3.bf16.msra.mxu1 %v3281_v30 }
  0x78   : > { %3051 = vmatprep.subr.bf16.mxu1 %v3481_v3  ;;  %3075 = vmatprep.subr.bf16.mxu0 %v3481_v3 }
  0xe2   : > { %v326_v8 = vpop.xlane.xlu0 %325 }
  0xe3   : > { %v328_v9 = vmul.f32 0.0078125, %v326_v8 }
  0xe5   : > { %v329_v10 = vsub.f32 %v324_v0, %v328_v9  ;;  %v3719_v9 = vsub.s32 %v702_v1, %v3688_v42 }
  0xe7   : > { %v330_v11 = vmul.f32 %v329_v10, %v329_v10 }
  0xe9   : > { %331 = vadd.xlane.f32.xlu0 %v330_v11 }
 0x172   : > { %v332_v31 = vpop.xlane.xlu0 %331 }
 0x173   : > { %v333_v32 = vmul.f32 0.0078125, %v332_v31 }
 0x175   : > { %v334_v33 = vadd.f32 1e-05, %v333_v32 }
 0x177   : > { %3290 = vrsqrt.f32 %v334_v33 }
 0x184   : > { %v3291_v34 = vpop.eup %3290 }
 0x185   : > { %v336_v36 = vmul.f32 %v3291_v34, %v329_v10 }
 0x187   : > { %v344_v38 = vmul.f32 %v2894_v35, %v336_v36 }
 0x189   : > { %v352_v39 = vadd.f32 %v2895_v37, %v344_v38 }
 0x18b   : > { %v353_v40 = vpack.c.bf16 %v352_v39, %v352_v39 }
 0x18d   : > { %564 = vmatmul.mubr.bf16.vlgmr.msra.gmra.mxu0 %v353_v40  ;;  %3048 = vmatmul.mubr.bf16.vlgmr.msra.gmra.mxu1 %v353_v40 }
 0x18e   : > { %3053 = vmatprep.mubr.msk.bf16.mxu1 %vm3483_vm0, %v3481_v3  ;;  %3077 = vmatprep.mubr.msk.bf16.mxu0 %vm3483_vm0, %v3481_v3 }
 0x24d   : > { %v565_v46 = vpop.f32.mrf.mxu0  ;;  %v3697_v47 = vpop.f32.mrf.mxu1 }
 0x24e   : > { %v566_v57 = vadd.f32 %v565_v46, %v391_v56 }
 0x24f   : > { %v567_v48 = vpop.f32.mrf.mxu0  ;;  %v3049_v49 = vpop.f32.mrf.mxu1 }
 0x250   : > { %v568_v51 = vadd.f32 %v567_v48, %v395_v45 }
 0x251   : > { %v569_v52 = vpop.f32.mrf.mxu0  ;;  %v609_v53 = vpop.f32.mrf.mxu1 }
 0x252   : > { %921 = vrot.lane.b32.xlu0 %v568_v51, %s3484_s14  ;;  %915 = vrot.lane.b32.xlu1 %v568_v51, %s3485_s18 }
 0x253   : > { %v570_v54 = vpop.f32.mrf.mxu0  ;;  %v3050_v55 = vpop.f32.mrf.mxu1 }
 0x256   : > { %933 = vrot.lane.b32.xlu0 %v568_v51, %s3486_s19  ;;  %918 = vrot.lane.b32.xlu1 %v568_v51, %s3487_s17 }
 0x25a   : > { %625 = vrot.lane.b32.xlu0 %v566_v57, %s3488_s21  ;;  %613 = vrot.lane.b32.xlu1 %v566_v57, %s3485_s18 }
 0x25e   : > { %631 = vrot.lane.b32.xlu0 %v566_v57, %s3486_s19  ;;  %616 = vrot.lane.b32.xlu1 %v566_v57, %s3487_s17 }
 0x262   : > { %619 = vrot.lane.b32.xlu1 %v566_v57, %s3484_s14 }
 0x266   : > { %924 = vrot.lane.b32.xlu1 %v568_v51, %s3489_s12 }
 0x26a   : > { %927 = vrot.lane.b32.xlu1 %v568_v51, %s3488_s21 }
 0x26e   : > { %930 = vrot.lane.b32.xlu1 %v568_v51, %s3490_s3 }
 0x272   : > { %622 = vrot.lane.b32.xlu1 %v566_v57, %s3489_s12 }
 0x276   : > { %628 = vrot.lane.b32.xlu1 %v566_v57, %s3490_s3 }
 0x2c4   : > { %v922_v63 = vpop.permute.xlu0 %921  ;;  %v916_v0 = vpop.permute.xlu1 %915 }
 0x2c5   : > { %v952_v4 = vcombine.low %v916_v0, %v922_v63  ;;  %v953_v5 = vcombine.high %v916_v0, %v922_v63 }
 0x2c7   : > { %v960_v10 = vrot.slane %v952_v4, %v3716_v2  ;;  %v967_v11 = vrot.slane %v953_v5, %v3716_v2 }
 0x2c8   : > { %v919_v6 = vpop.permute.xlu1 %918  ;;  %v3725_v15 = vpop.permute.xlu0 %933 }
 0x2c9   : > { %v936_v7 = vcombine.low %v568_v51, %v919_v6  ;;  %v937_v8 = vcombine.high %v568_v51, %v919_v6 }
 0x2cb   : > { %v944_v12 = vrot.slane %v936_v7, %v3716_v2  ;;  %v951_v13 = vrot.slane %v937_v8, %v3716_v2 }
 0x2cc   : > { %v614_v14 = vpop.permute.xlu1 %613  ;;  %v626_v35 = vpop.permute.xlu0 %625 }
 0x2cd   : > { %v1000_v16 = vcombine.low %v944_v12, %v960_v10  ;;  %v1001_v17 = vcombine.high %v944_v12, %v960_v10  ;;  %v1016_v18 = vcombine.low %v951_v13, %v967_v11  ;;  %v1017_v19 = vcombine.high %v951_v13, %v967_v11 }
 0x2cf   : > { %v1008_v20 = vrot.slane %v1000_v16, %v3719_v9  ;;  %v1015_v21 = vrot.slane %v1001_v17, %v3719_v9  ;;  %v1024_v22 = vrot.slane %v1016_v18, %v3719_v9  ;;  %v1031_v23 = vrot.slane %v1017_v19, %v3719_v9 }
 0x2d0   : > { %v617_v24 = vpop.permute.xlu1 %616  ;;  %v632_v51 = vpop.permute.xlu0 %631 }
 0x2d1   : > { %v2928_v25 = vcombine.low %v1008_v20, %v1015_v21  ;;  %v2930_v26 = vcombine.high %v1008_v20, %v1015_v21  ;;  %v2932_v27 = vcombine.low %v1024_v22, %v1031_v23  ;;  %v2934_v28 = vcombine.high %v1024_v22, %v1031_v23 }
 0x2d2   : > { %v634_v29 = vcombine.low %v566_v57, %v617_v24  ;;  %v635_v30 = vcombine.high %v566_v57, %v617_v24  ;;  %v682_v63 = vcombine.low %v626_v35, %v632_v51  ;;  %v683_v0 = vcombine.high %v626_v35, %v632_v51 }
 0x2d3   : > { %v1080_v31 = vrot.slane %v2928_v25, %v3716_v2  ;;  %v1096_v32 = vrot.slane %v2930_v26, %v3716_v2  ;;  %v1112_v33 = vrot.slane %v2932_v27, %v3716_v2  ;;  %v1128_v34 = vrot.slane %v2934_v28, %v3716_v2 }
 0x2d4   : > { %v620_v36 = vpop.permute.xlu1 %619  ;;  %v642_v41 = vrot.slane %v634_v29, %v3716_v2  ;;  %v649_v43 = vrot.slane %v635_v30, %v3716_v2  ;;  %v690_v24 = vrot.slane %v682_v63, %v3716_v2  ;;  %v697_v25 = vrot.slane %v683_v0, %v3716_v2 }
 0x2d5   : > { %v650_v37 = vcombine.low %v614_v14, %v620_v36  ;;  %v651_v38 = vcombine.high %v614_v14, %v620_v36  ;;  %v1136_v39 = vcombine.low %v1080_v31, %v1096_v32  ;;  %v1168_v40 = vcombine.low %v1112_v33, %v1128_v34 }
 0x2d6   : > { %v1137_v57 = vcombine.high %v1080_v31, %v1096_v32  ;;  %v1169_v58 = vcombine.high %v1112_v33, %v1128_v34 }
 0x2d7   : > { %v658_v45 = vrot.slane %v650_v37, %v3716_v2  ;;  %v665_v46 = vrot.slane %v651_v38, %v3716_v2  ;;  %v1144_v48 = vrot.slane %v1136_v39, %v3719_v9  ;;  %v1176_v49 = vrot.slane %v1168_v40, %v3719_v9 }
 0x2d8   : > { %v925_v50 = vpop.permute.xlu1 %924  ;;  %v1151_v12 = vrot.slane %v1137_v57, %v3719_v9  ;;  %v1183_v13 = vrot.slane %v1169_v58, %v3719_v9 }
 0x2d9   : > { %v698_v52 = vcombine.low %v642_v41, %v658_v45  ;;  %v699_v53 = vcombine.high %v642_v41, %v658_v45  ;;  %v714_v54 = vcombine.low %v649_v43, %v665_v46  ;;  %v715_v55 = vcombine.high %v649_v43, %v665_v46 }
 0x2da   : > { %v1200_v56 = vcombine.low %v1144_v48, %v1176_v49  ;;  %v1201_v11 = vcombine.high %v1144_v48, %v1176_v49  ;;  %v1202_v31 = vcombine.low %v1151_v12, %v1183_v13  ;;  %v3763_v39 = vcombine.high %v1151_v12, %v1183_v13 }
 0x2db   : > { %v706_v59 = vrot.slane %v698_v52, %v3719_v9  ;;  %v713_v60 = vrot.slane %v699_v53, %v3719_v9  ;;  %v722_v61 = vrot.slane %v714_v54, %v3719_v9  ;;  %v729_v62 = vrot.slane %v715_v55, %v3719_v9 }
 0x2dc   : > { %v928_v1 = vpop.permute.xlu1 %927  ;;  %v1208_v4 = vpack.c.bf16 %v1200_v56, %v1200_v56  ;;  %v1209_v30 = vpack.c.bf16 %v1201_v11, %v1201_v11 }
 0x2dd   : > { %v2920_v5 = vcombine.low %v706_v59, %v713_v60  ;;  %v2922_v6 = vcombine.high %v706_v59, %v713_v60  ;;  %v2924_v7 = vcombine.low %v722_v61, %v729_v62  ;;  %v2926_v8 = vcombine.high %v722_v61, %v729_v62 }
 0x2de   : > { %v1523_v10 = vsel %vm1518_vm1, %v1208_v4, 0  ;;  %v984_v19 = vcombine.low %v928_v1, %v3725_v15  ;;  %v985_v20 = vcombine.high %v928_v1, %v3725_v15  ;;  %v1569_v48 = vsel %vm1518_vm1, %v1209_v30, 0 }
 0x2df   : > { %v778_v14 = vrot.slane %v2920_v5, %v3716_v2  ;;  %v794_v16 = vrot.slane %v2922_v6, %v3716_v2  ;;  %v810_v17 = vrot.slane %v2924_v7, %v3716_v2  ;;  %v826_v18 = vrot.slane %v2926_v8, %v3716_v2  ;;  %3052 = vmatpush3.bf16.xpose.msra.mxu1 %v1523_v10 }
 0x2e0   : > { %v931_v21 = vpop.permute.xlu1 %930  ;;  %3057 = vmatprep.subr.bf16.mxu1 %v3481_v3  ;;  %v992_v32 = vrot.slane %v984_v19, %v3716_v2  ;;  %v999_v15 = vrot.slane %v985_v20, %v3716_v2 }
 0x2e1   : > { %v834_v22 = vcombine.low %v778_v14, %v794_v16  ;;  %v866_v23 = vcombine.low %v810_v17, %v826_v18  ;;  %v968_v26 = vcombine.low %v925_v50, %v931_v21  ;;  %v969_v27 = vcombine.high %v925_v50, %v931_v21 }
 0x2e2   : > { %v835_v36 = vcombine.high %v778_v14, %v794_v16  ;;  %v867_v37 = vcombine.high %v810_v17, %v826_v18  ;;  %v1210_v50 = vpack.c.bf16 %v1202_v31, %v1202_v31 }
 0x2e3   : > { %v842_v28 = vrot.slane %v834_v22, %v3719_v9  ;;  %v874_v29 = vrot.slane %v866_v23, %v3719_v9  ;;  %v976_v33 = vrot.slane %v968_v26, %v3716_v2  ;;  %v983_v34 = vrot.slane %v969_v27, %v3716_v2 }
 0x2e4   : > { %v623_v35 = vpop.permute.xlu1 %622  ;;  %v3772_v58 = vrot.slane %v835_v36, %v3719_v9  ;;  %v3775_v59 = vrot.slane %v867_v37, %v3719_v9  ;;  %v1615_v23 = vsel %vm1518_vm1, %v1210_v50, 0 }
 0x2e5   : > { %v898_v38 = vcombine.low %v842_v28, %v874_v29  ;;  %v1032_v40 = vcombine.low %v976_v33, %v992_v32  ;;  %v1033_v41 = vcombine.high %v976_v33, %v992_v32  ;;  %v1048_v43 = vcombine.low %v983_v34, %v999_v15 }
 0x2e6   : > { %v1049_v45 = vcombine.high %v983_v34, %v999_v15  ;;  %v899_v49 = vcombine.high %v842_v28, %v874_v29 }
 0x2e7   : > { %v906_v46 = vpack.c.bf16 %v898_v38, %v898_v38  ;;  %v1040_v51 = vrot.slane %v1032_v40, %v3719_v9  ;;  %v1047_v52 = vrot.slane %v1033_v41, %v3719_v9  ;;  %v1056_v53 = vrot.slane %v1048_v43, %v3719_v9 }
 0x2e8   : > { %v1063_v54 = vrot.slane %v1049_v45, %v3719_v9  ;;  %v629_v55 = vpop.permute.xlu1 %628  ;;  %v907_v4 = vpack.c.bf16 %v899_v49, %v899_v49  ;;  %v1211_v41 = vpack.c.bf16 %v3763_v39, %v3763_v39 }
 0x2e9   : > { %v666_v56 = vcombine.low %v623_v35, %v629_v55  ;;  %v667_v57 = vcombine.high %v623_v35, %v629_v55  ;;  %3054 = vmatmul.mubr.msk.bf16.vlgmr.msra.gmra.mxu1 %vm1518_vm1, %v906_v46  ;;  %v2929_v60 = vcombine.low %v1040_v51, %v1047_v52  ;;  %v2931_v61 = vcombine.high %v1040_v51, %v1047_v52 }
 0x2ea   : > { %v2933_v62 = vcombine.low %v1056_v53, %v1063_v54  ;;  %v2935_v63 = vcombine.high %v1056_v53, %v1063_v54  ;;  %3058 = vmatpush3.bf16.xpose.msra.mxu1 %v1569_v48  ;;  %3059 = vmatprep.mubr.msk.bf16.mxu1 %vm3483_vm0, %v3481_v3  ;;  %v1661_v52 = vsel %vm1518_vm1, %v1211_v41, 0 }
 0x2eb   : > { %v674_v0 = vrot.slane %v666_v56, %v3716_v2  ;;  %v681_v1 = vrot.slane %v667_v57, %v3716_v2  ;;  %3063 = vmatprep.subr.bf16.mxu1 %v3481_v3  ;;  %v1087_v5 = vrot.slane %v2929_v60, %v3716_v2  ;;  %v1103_v6 = vrot.slane %v2931_v61, %v3716_v2 }
 0x2ec   : > { %v1119_v7 = vrot.slane %v2933_v62, %v3716_v2  ;;  %v1135_v8 = vrot.slane %v2935_v63, %v3716_v2  ;;  %v901_v56 = vcombine.high %v3772_v58, %v3775_v59 }
 0x2ed   : > { %v730_v10 = vcombine.low %v674_v0, %v690_v24  ;;  %v731_v11 = vcombine.high %v674_v0, %v690_v24  ;;  %v746_v12 = vcombine.low %v681_v1, %v697_v25  ;;  %v747_v13 = vcombine.high %v681_v1, %v697_v25 }
 0x2ee   : > { %v1152_v14 = vcombine.low %v1087_v5, %v1103_v6  ;;  %v1184_v16 = vcombine.low %v1119_v7, %v1135_v8  ;;  %v1153_v17 = vcombine.high %v1087_v5, %v1103_v6  ;;  %v1185_v18 = vcombine.high %v1119_v7, %v1135_v8 }
 0x2ef   : > { %v738_v19 = vrot.slane %v730_v10, %v3719_v9  ;;  %v745_v20 = vrot.slane %v731_v11, %v3719_v9  ;;  %v754_v21 = vrot.slane %v746_v12, %v3719_v9  ;;  %v761_v22 = vrot.slane %v747_v13, %v3719_v9 }
 0x2f0   : > { %v1160_v26 = vrot.slane %v1152_v14, %v3719_v9  ;;  %v1192_v24 = vrot.slane %v1184_v16, %v3719_v9  ;;  %v900_v25 = vcombine.low %v3772_v58, %v3775_v59  ;;  %v1167_v32 = vrot.slane %v1153_v17, %v3719_v9 }
 0x2f1   : > { %v2921_v27 = vcombine.low %v738_v19, %v745_v20  ;;  %v2923_v28 = vcombine.high %v738_v19, %v745_v20  ;;  %v2925_v29 = vcombine.low %v754_v21, %v761_v22  ;;  %v2927_v30 = vcombine.high %v754_v21, %v761_v22  ;;  %3060 = vmatmul.mubr.msk.bf16.vlgmr.msra.gmra.mxu1 %vm1518_vm1, %v907_v4 }
 0x2f2   : > { %3064 = vmatpush3.bf16.xpose.msra.mxu1 %v1615_v23  ;;  %v1204_v31 = vcombine.low %v1160_v26, %v1192_v24  ;;  %3065 = vmatprep.mubr.msk.bf16.mxu1 %vm3483_vm0, %v3481_v3  ;;  %v1199_v15 = vrot.slane %v1185_v18, %v3719_v9  ;;  %v908_v46 = vpack.c.bf16 %v900_v25, %v900_v25  ;;  %v398_v18 = vsub.s32 2, %v3688_v42 }
 0x2f3   : > { %v785_v33 = vrot.slane %v2921_v27, %v3716_v2  ;;  %v801_v34 = vrot.slane %v2923_v28, %v3716_v2  ;;  %v817_v35 = vrot.slane %v2925_v29, %v3716_v2  ;;  %v833_v36 = vrot.slane %v2927_v30, %v3716_v2  ;;  %3069 = vmatprep.subr.bf16.mxu1 %v3481_v3 }
 0x2f4   : > { %v1212_v37 = vpack.c.bf16 %v1204_v31, %v1204_v31  ;;  %v1206_v45 = vcombine.low %v1167_v32, %v1199_v15  ;;  %v1205_v54 = vcombine.high %v1160_v26, %v1192_v24  ;;  %v909_v63 = vpack.c.bf16 %v901_v56, %v901_v56 }
 0x2f5   : > { %v850_v38 = vcombine.low %v785_v33, %v801_v34  ;;  %v882_v40 = vcombine.low %v817_v35, %v833_v36  ;;  %v851_v50 = vcombine.high %v785_v33, %v801_v34  ;;  %v883_v51 = vcombine.high %v817_v35, %v833_v36 }
 0x2f6   : > { %v1707_v43 = vsel %vm1518_vm1, %v1212_v37, 0  ;;  %v1214_v39 = vpack.c.bf16 %v1206_v45, %v1206_v45  ;;  %v1213_v61 = vpack.c.bf16 %v1205_v54, %v1205_v54  ;;  %v1207_v59 = vcombine.high %v1167_v32, %v1199_v15 }
 0x2f7   : > { %3076 = vmatpush3.bf16.xpose.msra.mxu0 %v1707_v43  ;;  %v858_v48 = vrot.slane %v850_v38, %v3719_v9  ;;  %v890_v49 = vrot.slane %v882_v40, %v3719_v9  ;;  %v865_v57 = vrot.slane %v851_v50, %v3719_v9  ;;  %v897_v60 = vrot.slane %v883_v51, %v3719_v9 }
 0x2f8   : > { %3087 = vmatprep.subr.bf16.mxu0 %v3481_v3  ;;  %v1799_v62 = vsel %vm1518_vm1, %v1214_v39, 0  ;;  %v1753_v58 = vsel %vm1518_vm1, %v1213_v61, 0  ;;  %v1215_v5 = vpack.c.bf16 %v1207_v59, %v1207_v59  ;;  %v399_v21 = vrot.slane %v3694_v44, %v398_v18 }
 0x2f9   : > { %3066 = vmatmul.mubr.msk.bf16.vlgmr.msra.gmra.mxu1 %vm1518_vm1, %v908_v46  ;;  %v902_v53 = vcombine.low %v858_v48, %v890_v49  ;;  %v904_v0 = vcombine.low %v865_v57, %v897_v60  ;;  %v903_v1 = vcombine.high %v858_v48, %v890_v49  ;;  %v905_v8 = vcombine.high %v865_v57, %v897_v60 }
 0x2fa   : > { %3070 = vmatpush3.bf16.xpose.msra.mxu1 %v1661_v52  ;;  %3071 = vmatprep.mubr.msk.bf16.mxu1 %vm3483_vm0, %v3481_v3  ;;  %v1845_v7 = vsel %vm1518_vm1, %v1215_v5, 0  ;;  %v3847_v26 = vadd.f32 %v3697_v47, %v399_v21 }
 0x2fb   : > { %v910_v55 = vpack.c.bf16 %v902_v53, %v902_v53  ;;  %3081 = vmatprep.subr.bf16.mxu1 %v3481_v3  ;;  %v912_v4 = vpack.c.bf16 %v904_v0, %v904_v0  ;;  %v911_v6 = vpack.c.bf16 %v903_v1, %v903_v1  ;;  %v913_v10 = vpack.c.bf16 %v905_v8, %v905_v8 }
 0x2fe   : > { %3078 = vmatmul.mubr.msk.bf16.vlgmr.msra.gmra.mxu0 %vm1518_vm1, %v910_v55 }
 0x2ff   : > { %3088 = vmatpush3.bf16.xpose.msra.mxu0 %v1799_v62  ;;  %3089 = vmatprep.mubr.msk.bf16.mxu0 %vm3483_vm0, %v3481_v3 }
 0x300   : > { %3099 = vmatprep.subr.bf16.mxu0 %v3481_v3 }
 0x301   : > { %3072 = vmatmul.mubr.msk.bf16.vlgmr.msra.gmra.mxu1 %vm1518_vm1, %v909_v63 }
 0x302   : > { %3082 = vmatpush3.bf16.xpose.msra.mxu1 %v1753_v58  ;;  %3083 = vmatprep.mubr.msk.bf16.mxu1 %vm3483_vm0, %v3481_v3 }
 0x303   : > { %3093 = vmatprep.subr.bf16.mxu1 %v3481_v3 }
 0x306   : > { %3090 = vmatmul.mubr.msk.bf16.vlgmr.msra.gmra.mxu0 %vm1518_vm1, %v912_v4 }
 0x307   : > { %3101 = vmatprep.mubr.msk.bf16.mxu0 %vm3483_vm0, %v3481_v3 }
 0x309   : > { %3084 = vmatmul.mubr.msk.bf16.vlgmr.msra.gmra.mxu1 %vm1518_vm1, %v911_v6 }
 0x30a   : > { %3094 = vmatpush3.bf16.xpose.msra.mxu1 %v1845_v7  ;;  %3095 = vmatprep.mubr.msk.bf16.mxu1 %vm3483_vm0, %v3481_v3 }
 0x30b   : > { %3105 = vmatprep.subr.bf16.mxu1 %v3481_v3 }
 0x311   : > { %3096 = vmatmul.mubr.msk.bf16.vlgmr.msra.gmra.mxu1 %vm1518_vm1, %v913_v10 }
 0x312   : > { %3107 = vmatprep.mubr.msk.bf16.mxu1 %vm3483_vm0, %v3481_v3 }
 0x3a9   : > { %v1559_v11 = vpop.f32.mrf.mxu1 }
 0x3aa   : > { %v1888_v12 = vsel %vm1887_vm2, %v1559_v11, -inf }
 0x3ab   : > { %1889 = vmax.xlane.f32.xlu1 %v1888_v12  ;;  %v3055_v13 = vpop.f32.mrf.mxu1 }
 0x3ad   : > { %v1562_v14 = vpop.f32.mrf.mxu1 }
 0x3af   : > { %v3056_v16 = vpop.f32.mrf.mxu1 }
 0x3b1   : > { %v1605_v17 = vpop.f32.mrf.mxu1 }
 0x3b2   : > { %v1891_v47 = vsel %vm1887_vm2, %v1605_v17, -inf }
 0x3b3   : > { %v3061_v19 = vpop.f32.mrf.mxu1 }
 0x3b5   : > { %v1608_v20 = vpop.f32.mrf.mxu1 }
 0x3b7   : > { %v3062_v22 = vpop.f32.mrf.mxu1 }
 0x3b9   : > { %v3844_v23 = vpop.f32.mrf.mxu1 }
 0x3ba   : > { %v1894_v41 = vsel %vm1887_vm2, %v3844_v23, -inf }
 0x3bb   : > { %v3067_v24 = vpop.f32.mrf.mxu1 }
 0x3bc   : > { %1220 = vrot.lane.b32.xlu1 %v3847_v26, %s3487_s17 }
 0x3bd   : > { %v1654_v25 = vpop.f32.mrf.mxu1 }
 0x3be   : > { %v1743_v27 = vpop.f32.mrf.mxu0 }
 0x3bf   : > { %v3068_v28 = vpop.f32.mrf.mxu1  ;;  %v1900_v29 = vsel %vm1887_vm2, %v1743_v27, -inf }
 0x3c0   : > { %1901 = vmax.xlane.f32.xlu0 %v1900_v29  ;;  %v3079_v42 = vpop.f32.mrf.mxu0  ;;  %1223 = vrot.lane.b32.xlu1 %v3847_v26, %s3484_s14 }
 0x3c1   : > { %v3854_v44 = vpop.f32.mrf.mxu1 }
 0x3c2   : > { %v1746_v30 = vpop.f32.mrf.mxu0  ;;  %v1897_v52 = vsel %vm1887_vm2, %v3854_v44, -inf }
 0x3c3   : > { %v3073_v31 = vpop.f32.mrf.mxu1 }
 0x3c4   : > { %1892 = vmax.xlane.f32.xlu0 %v1891_v47  ;;  %v3080_v32 = vpop.f32.mrf.mxu0 }
 0x3c5   : > { %v1700_v15 = vpop.f32.mrf.mxu1 }
 0x3c6   : > { %v3857_v33 = vpop.f32.mrf.mxu0 }
 0x3c7   : > { %v3074_v34 = vpop.f32.mrf.mxu1  ;;  %v1906_v35 = vsel %vm1887_vm2, %v3857_v33, -inf }
 0x3c8   : > { %1907 = vmax.xlane.f32.xlu0 %v1906_v35  ;;  %v3091_v36 = vpop.f32.mrf.mxu0 }
 0x3c9   : > { %v3861_v37 = vpop.f32.mrf.mxu1 }
 0x3ca   : > { %v1838_v38 = vpop.f32.mrf.mxu0  ;;  %v1903_v53 = vsel %vm1887_vm2, %v3861_v37, -inf }
 0x3cb   : > { %v3085_v40 = vpop.f32.mrf.mxu1 }
 0x3cc   : > { %1895 = vmax.xlane.f32.xlu0 %v1894_v41  ;;  %v3092_v43 = vpop.f32.mrf.mxu0 }
 0x3cd   : > { %v1792_v45 = vpop.f32.mrf.mxu1 }
 0x3cf   : > { %v3086_v46 = vpop.f32.mrf.mxu1 }
 0x3d1   : > { %v3865_v48 = vpop.f32.mrf.mxu1 }
 0x3d2   : > { %v1909_v54 = vsel %vm1887_vm2, %v3865_v48, -inf }
 0x3d3   : > { %v3097_v49 = vpop.f32.mrf.mxu1 }
 0x3d5   : > { %v1884_v50 = vpop.f32.mrf.mxu1 }
 0x3d7   : > { %v3098_v51 = vpop.f32.mrf.mxu1 }
 0x3e2   : > { %1217 = vrot.lane.b32.xlu0 %v3847_v26, %s3485_s18 }
 0x3e4   : > { %1898 = vmax.xlane.f32.xlu1 %v1897_v52 }
 0x3e8   : > { %1904 = vmax.xlane.f32.xlu1 %v1903_v53 }
 0x3ec   : > { %1910 = vmax.xlane.f32.xlu1 %v1909_v54 }
 0x3fd   : > { %1226 = vrot.lane.b32.xlu1 %v3847_v26, %s3489_s12 }
 0x434   : > { %v1890_v39 = vpop.xlane.xlu1 %1889 }
 0x435   : > { %v1912_v55 = vsub.f32 %v1559_v11, %v1890_v39 }
 0x437   : > { %v1920_v56 = vmul.f32 1.442695, %v1912_v55 }
 0x438   : > { %v1221_v4 = vpop.permute.xlu1 %1220 }
 0x439   : > { %3292 = vpow2.f32 %v1920_v56  ;;  %v1238_v7 = vcombine.low %v3847_v26, %v1221_v4  ;;  %v1239_v8 = vcombine.high %v3847_v26, %v1221_v4 }
 0x43b   : > { %v1253_v18 = vrot.slane %v1239_v8, %v3716_v2 }
 0x43c   : > { %v1224_v11 = vpop.permute.xlu1 %1223 }
 0x446   : > { %v3877_v57 = vpop.eup %3292 }
 0x447   : > { %v1936_v60 = vsel %vm1887_vm2, %v3877_v57, 0.0 }
 0x448   : > { %1937 = vadd.xlane.f32.xlu0 %v1936_v60 }
 0x449   : > { %v1902_v61 = vpop.xlane.xlu0 %1901 }
 0x44a   : > { %v1916_v62 = vsub.f32 %v1743_v27, %v1902_v61 }
 0x44c   : > { %v1928_v63 = vmul.f32 1.442695, %v1916_v62 }
 0x44d   : > { %v1893_v0 = vpop.xlane.xlu0 %1892 }
 0x44e   : > { %3294 = vpow2.f32 %v1928_v63  ;;  %v1913_v58 = vsub.f32 %v1605_v17, %v1893_v0  ;;  %v1246_v17 = vrot.slane %v1238_v7, %v3716_v2 }
 0x450   : > { %v1922_v59 = vmul.f32 1.442695, %v1913_v58 }
 0x451   : > { %v3881_v1 = vpop.xlane.xlu0 %1907 }
 0x452   : > { %3296 = vpow2.f32 %v1922_v59 }
 0x455   : > { %v1896_v5 = vpop.xlane.xlu0 %1895 }
 0x456   : > { %v1914_v6 = vsub.f32 %v3844_v23, %v1896_v5 }
 0x458   : > { %v1924_v10 = vmul.f32 1.442695, %v1914_v6 }
 0x459   : > { %v1218_v12 = vpop.permute.xlu0 %1217 }
 0x45a   : > { %3298 = vpow2.f32 %v1924_v10  ;;  %v1254_v13 = vcombine.low %v1218_v12, %v1224_v11  ;;  %v1255_v14 = vcombine.high %v1218_v12, %v1224_v11  ;;  %v1918_v12 = vsub.f32 %v3857_v33, %v3881_v1 }
 0x45b   : > { %v3886_v16 = vpop.eup %3294 }
 0x45c   : > { %v1262_v19 = vrot.slane %v1254_v13, %v3716_v2  ;;  %v1269_v20 = vrot.slane %v1255_v14, %v3716_v2  ;;  %v1948_v21 = vsel %vm1887_vm2, %v3886_v16, 0.0  ;;  %v1932_v14 = vmul.f32 1.442695, %v1918_v12 }
 0x45d   : > { %1949 = vadd.xlane.f32.xlu0 %v1948_v21 }
 0x45e   : > { %v1302_v22 = vcombine.low %v1246_v17, %v1262_v19  ;;  %v1303_v23 = vcombine.high %v1246_v17, %v1262_v19  ;;  %v1318_v24 = vcombine.low %v1253_v18, %v1269_v20  ;;  %v1319_v25 = vcombine.high %v1253_v18, %v1269_v20 }
 0x45f   : > { %v3894_v27 = vpop.eup %3296 }
 0x460   : > { %v1310_v28 = vrot.slane %v1302_v22, %v3719_v9  ;;  %v1317_v29 = vrot.slane %v1303_v23, %v3719_v9  ;;  %v1326_v42 = vrot.slane %v1318_v24, %v3719_v9  ;;  %v1333_v30 = vrot.slane %v1319_v25, %v3719_v9 }
 0x461   : > { %v1939_v31 = vsel %vm1887_vm2, %v3894_v27, 0.0 }
 0x462   : > { %v2936_v47 = vcombine.low %v1310_v28, %v1317_v29  ;;  %v2938_v32 = vcombine.high %v1310_v28, %v1317_v29  ;;  %v2940_v15 = vcombine.low %v1326_v42, %v1333_v30  ;;  %v2942_v34 = vcombine.high %v1326_v42, %v1333_v30  ;;  %1940 = vadd.xlane.f32.xlu1 %v1939_v31 }
 0x464   : > { %v1382_v35 = vrot.slane %v2936_v47, %v3716_v2  ;;  %v1398_v36 = vrot.slane %v2938_v32, %v3716_v2  ;;  %v1414_v38 = vrot.slane %v2940_v15, %v3716_v2  ;;  %v1430_v40 = vrot.slane %v2942_v34, %v3716_v2 }
 0x466   : > { %v1438_v41 = vcombine.low %v1382_v35, %v1398_v36  ;;  %v1470_v43 = vcombine.low %v1414_v38, %v1430_v40  ;;  %v1439_v45 = vcombine.high %v1382_v35, %v1398_v36  ;;  %v1471_v46 = vcombine.high %v1414_v38, %v1430_v40 }
 0x467   : > { %v3906_v49 = vpop.eup %3298 }
 0x468   : > { %v1942_v50 = vsel %vm1887_vm2, %v3906_v49, 0.0  ;;  %v1446_v51 = vrot.slane %v1438_v41, %v3719_v9  ;;  %v1478_v52 = vrot.slane %v1470_v43, %v3719_v9  ;;  %v1453_v53 = vrot.slane %v1439_v45, %v3719_v9 }
 0x469   : > { %1943 = vadd.xlane.f32.xlu0 %v1942_v50  ;;  %v1485_v54 = vrot.slane %v1471_v46, %v3719_v9 }
 0x46a   : > { %v1502_v39 = vcombine.low %v1446_v51, %v1478_v52  ;;  %v1503_v55 = vcombine.high %v1446_v51, %v1478_v52 }
 0x46b   : > { %v1504_v56 = vcombine.low %v1453_v53, %v1485_v54  ;;  %v1505_v60 = vcombine.high %v1453_v53, %v1485_v54 }
 0x46c   : > { %v1510_v61 = vpack.c.bf16 %v1502_v39, %v1502_v39  ;;  %v1511_v62 = vpack.c.bf16 %v1503_v55, %v1503_v55 }
 0x46d   : > { %v1899_v63 = vpop.xlane.xlu1 %1898  ;;  %v1512_v1 = vpack.c.bf16 %v1504_v56, %v1504_v56  ;;  %v1513_v30 = vpack.c.bf16 %v1505_v60, %v1505_v60 }
 0x46e   : > { %v1915_v0 = vsub.f32 %v3854_v44, %v1899_v63  ;;  %v1989_v58 = vsel %vm1987_vm3, %v1510_v61, 0  ;;  %v2035_v59 = vsel %vm1987_vm3, %v1511_v62, 0 }
 0x46f   : > { %3100 = vmatpush3.bf16.msra.mxu0 %v1989_v58  ;;  %3106 = vmatpush3.bf16.msra.mxu1 %v2035_v59  ;;  %v2081_v23 = vsel %vm1987_vm3, %v1512_v1, 0  ;;  %v2127_v47 = vsel %vm1987_vm3, %v1513_v30, 0 }
 0x470   : > { %v1926_v4 = vmul.f32 1.442695, %v1915_v0  ;;  %3111 = vmatprep.subr.bf16.mxu0 %v3481_v3  ;;  %3117 = vmatprep.subr.bf16.mxu1 %v3481_v3 }
 0x471   : > { %v1905_v5 = vpop.xlane.xlu1 %1904 }
 0x472   : > { %3300 = vpow2.f32 %v1926_v4  ;;  %v1917_v6 = vsub.f32 %v3861_v37, %v1905_v5 }
 0x474   : > { %v1930_v7 = vmul.f32 1.442695, %v1917_v6 }
 0x475   : > { %v1911_v37 = vpop.xlane.xlu1 %1910 }
 0x476   : > { %3302 = vpow2.f32 %v1930_v7  ;;  %v1919_v13 = vsub.f32 %v3865_v48, %v1911_v37 }
 0x477   : > { %3304 = vpow2.f32 %v1932_v14 }
 0x478   : > { %v1934_v17 = vmul.f32 1.442695, %v1919_v13 }
 0x479   : > { %v1227_v24 = vpop.permute.xlu1 %1226 }
 0x47a   : > { %3306 = vpow2.f32 %v1934_v17 }
 0x47f   : > { %v3920_v8 = vpop.eup %3300 }
 0x480   : > { %v1945_v44 = vsel %vm1887_vm2, %v3920_v8, 0.0 }
 0x481   : > { %1946 = vadd.xlane.f32.xlu1 %v1945_v44 }
 0x483   : > { %v3924_v10 = vpop.eup %3302 }
 0x484   : > { %v1951_v11 = vsel %vm1887_vm2, %v3924_v10, 0.0  ;;  %v3937_v18 = vpop.eup %3304 }
 0x485   : > { %1952 = vadd.xlane.f32.xlu0 %v1951_v11  ;;  %v1954_v20 = vsel %vm1887_vm2, %v3937_v18, 0.0 }
 0x487   : > { %v3939_v19 = vpop.eup %3306 }
 0x492   : > { %1232 = vrot.lane.b32.xlu1 %v3847_v26, %s3490_s3 }
 0x496   : > { %1235 = vrot.lane.b32.xlu1 %v3847_v26, %s3486_s19 }
 0x49b   : > { %1229 = vrot.lane.b32.xlu0 %v3847_v26, %s3488_s21  ;;  %v1957_v26 = vsel %vm1887_vm2, %v3939_v19, 0.0 }
 0x4ba   : > { %1955 = vadd.xlane.f32.xlu0 %v1954_v20  ;;  %1958 = vadd.xlane.f32.xlu1 %v1957_v26 }
 0x4d1   : > { %v1938_v21 = vpop.xlane.xlu0 %1937 }
 0x4d2   : > { %3308 = vrcp.f32 %v1938_v21 }
 0x4df   : > { %v3309_v33 = vpop.eup %3308 }
 0x4e0   : > { %v1968_v48 = vmul.f32 %v3309_v33, %v3877_v57 }
 0x4e2   : > { %v1976_v22 = vpack.c.bf16 %v1968_v48, %v1968_v48 }
 0x4e4   : > { %3102 = vmatmul.mubr.msk.bf16.vlgmr.msra.gmra.mxu0 %vm1887_vm2, %v1976_v22 }
 0x4e5   : > { %3112 = vmatpush3.bf16.msra.mxu0 %v2081_v23  ;;  %3113 = vmatprep.mubr.msk.bf16.mxu0 %vm3483_vm0, %v3481_v3 }
 0x4e6   : > { %3123 = vmatprep.subr.bf16.mxu0 %v3481_v3  ;;  %v1950_v28 = vpop.xlane.xlu0 %1949 }
 0x4eb   : > { %v1941_v25 = vpop.xlane.xlu1 %1940 }
 0x4ec   : > { %3310 = vrcp.f32 %v1941_v25 }
 0x4f2   : > { %v1944_v29 = vpop.xlane.xlu0 %1943 }
 0x4f3   : > { %3312 = vrcp.f32 %v1944_v29 }
 0x4f9   : > { %v3311_v42 = vpop.eup %3310 }
 0x4fa   : > { %v1969_v57 = vmul.f32 %v3311_v42, %v3894_v27 }
 0x4fc   : > { %v1977_v31 = vpack.c.bf16 %v1969_v57, %v1969_v57 }
 0x4fe   : > { %3108 = vmatmul.mubr.msk.bf16.vlgmr.msra.gmra.mxu1 %vm1887_vm2, %v1977_v31 }
 0x4ff   : > { %3118 = vmatpush3.bf16.msra.mxu1 %v2127_v47  ;;  %3119 = vmatprep.mubr.msk.bf16.mxu1 %vm3483_vm0, %v3481_v3 }
 0x500   : > { %v3313_v32 = vpop.eup %3312  ;;  %3129 = vmatprep.subr.bf16.mxu1 %v3481_v3 }
 0x501   : > { %v1970_v15 = vmul.f32 %v3313_v32, %v3906_v49 }
 0x503   : > { %v1978_v34 = vpack.c.bf16 %v1970_v15, %v1970_v15 }
 0x505   : > { %3114 = vmatmul.mubr.msk.bf16.vlgmr.msra.gmra.mxu0 %vm1887_vm2, %v1978_v34 }
 0x506   : > { %3125 = vmatprep.mubr.msk.bf16.mxu0 %vm3483_vm0, %v3481_v3 }
 0x50a   : > { %v1947_v27 = vpop.xlane.xlu1 %1946 }
 0x50b   : > { %3314 = vrcp.f32 %v1947_v27 }
 0x50c   : > { %3316 = vrcp.f32 %v1950_v28 }
 0x50e   : > { %v1953_v35 = vpop.xlane.xlu0 %1952  ;;  %v1233_v36 = vpop.permute.xlu1 %1232 }
 0x50f   : > { %v1270_v38 = vcombine.low %v1227_v24, %v1233_v36  ;;  %v1271_v40 = vcombine.high %v1227_v24, %v1233_v36  ;;  %3318 = vrcp.f32 %v1953_v35 }
 0x511   : > { %v1278_v49 = vrot.slane %v1270_v38, %v3716_v2  ;;  %v1285_v50 = vrot.slane %v1271_v40, %v3716_v2 }
 0x512   : > { %v1230_v41 = vpop.permute.xlu0 %1229  ;;  %v1236_v43 = vpop.permute.xlu1 %1235 }
 0x513   : > { %v1286_v45 = vcombine.low %v1230_v41, %v1236_v43  ;;  %v1287_v46 = vcombine.high %v1230_v41, %v1236_v43 }
 0x515   : > { %v1294_v51 = vrot.slane %v1286_v45, %v3716_v2  ;;  %v1301_v52 = vrot.slane %v1287_v46, %v3716_v2 }
 0x517   : > { %v1334_v53 = vcombine.low %v1278_v49, %v1294_v51  ;;  %v1335_v54 = vcombine.high %v1278_v49, %v1294_v51  ;;  %v1350_v39 = vcombine.low %v1285_v50, %v1301_v52  ;;  %v1351_v55 = vcombine.high %v1285_v50, %v1301_v52 }
 0x518   : > { %v3315_v56 = vpop.eup %3314 }
 0x519   : > { %v1342_v60 = vrot.slane %v1334_v53, %v3719_v9  ;;  %v1349_v61 = vrot.slane %v1335_v54, %v3719_v9  ;;  %v1358_v62 = vrot.slane %v1350_v39, %v3719_v9  ;;  %v1365_v63 = vrot.slane %v1351_v55, %v3719_v9  ;;  %v3317_v17 = vpop.eup %3316 }
 0x51a   : > { %v1971_v0 = vmul.f32 %v3315_v56, %v3920_v8  ;;  %v1972_v29 = vmul.f32 %v3317_v17, %v3886_v16 }
 0x51b   : > { %v2937_v58 = vcombine.low %v1342_v60, %v1349_v61  ;;  %v2939_v59 = vcombine.high %v1342_v60, %v1349_v61  ;;  %v2941_v4 = vcombine.low %v1358_v62, %v1365_v63  ;;  %v2943_v5 = vcombine.high %v1358_v62, %v1365_v63 }
 0x51c   : > { %v1979_v6 = vpack.c.bf16 %v1971_v0, %v1971_v0  ;;  %v3319_v20 = vpop.eup %3318  ;;  %v1980_v32 = vpack.c.bf16 %v1972_v29, %v1972_v29 }
 0x51d   : > { %v1389_v7 = vrot.slane %v2937_v58, %v3716_v2  ;;  %v1405_v44 = vrot.slane %v2939_v59, %v3716_v2  ;;  %v1421_v11 = vrot.slane %v2941_v4, %v3716_v2  ;;  %v1437_v37 = vrot.slane %v2943_v5, %v3716_v2 }
 0x51e   : > { %3120 = vmatmul.mubr.msk.bf16.vlgmr.msra.gmra.mxu1 %vm1887_vm2, %v1979_v6  ;;  %v1973_v42 = vmul.f32 %v3319_v20, %v3924_v10 }
 0x51f   : > { %v1454_v12 = vcombine.low %v1389_v7, %v1405_v44  ;;  %v1486_v13 = vcombine.low %v1421_v11, %v1437_v37  ;;  %3131 = vmatprep.mubr.msk.bf16.mxu1 %vm3483_vm0, %v3481_v3  ;;  %v1455_v8 = vcombine.high %v1389_v7, %v1405_v44  ;;  %v1487_v14 = vcombine.high %v1421_v11, %v1437_v37 }
 0x520   : > { %v1981_v15 = vpack.c.bf16 %v1973_v42, %v1973_v42 }
 0x521   : > { %v1462_v26 = vrot.slane %v1454_v12, %v3719_v9  ;;  %v1494_v21 = vrot.slane %v1486_v13, %v3719_v9  ;;  %v1469_v33 = vrot.slane %v1455_v8, %v3719_v9  ;;  %v1501_v48 = vrot.slane %v1487_v14, %v3719_v9 }
 0x523   : > { %v1506_v1 = vcombine.low %v1462_v26, %v1494_v21  ;;  %v1507_v22 = vcombine.high %v1462_v26, %v1494_v21  ;;  %v1508_v23 = vcombine.low %v1469_v33, %v1501_v48  ;;  %v1509_v24 = vcombine.high %v1469_v33, %v1501_v48  ;;  %v3282_v48 = vld [vmem:[#allocation7 + $0x38] sm:$0xff]  }
 0x525   : > { %v1514_v25 = vpack.c.bf16 %v1506_v1, %v1506_v1  ;;  %v1515_v28 = vpack.c.bf16 %v1507_v22, %v1507_v22  ;;  %v1516_v31 = vpack.c.bf16 %v1508_v23, %v1508_v23  ;;  %v1517_v47 = vpack.c.bf16 %v1509_v24, %v1509_v24 }
 0x527   : > { %v2173_v57 = vsel %vm1987_vm3, %v1514_v25, 0  ;;  %v2219_v30 = vsel %vm1987_vm3, %v1515_v28, 0  ;;  %v2265_v16 = vsel %vm1987_vm3, %v1516_v31, 0  ;;  %v2311_v10 = vsel %vm1987_vm3, %v1517_v47, 0  ;;  %v3283_v25 = vld [vmem:[#allocation7 + $0x30] sm:$0xff]  }
 0x528   : > { %3124 = vmatpush3.bf16.msra.mxu0 %v2173_v57  ;;  %3130 = vmatpush3.bf16.msra.mxu1 %v2219_v30 }
 0x529   : > { %3135 = vmatprep.subr.bf16.mxu0 %v3481_v3  ;;  %3141 = vmatprep.subr.bf16.mxu1 %v3481_v3 }
 0x52b   : > { %3126 = vmatmul.mubr.msk.bf16.vlgmr.msra.gmra.mxu0 %vm1887_vm2, %v1980_v32  ;;  %3132 = vmatmul.mubr.msk.bf16.vlgmr.msra.gmra.mxu1 %vm1887_vm2, %v1981_v15 }
 0x52c   : > { %3136 = vmatpush3.bf16.msra.mxu0 %v2265_v16  ;;  %3142 = vmatpush3.bf16.msra.mxu1 %v2311_v10 }
 0x52d   : > { %3137 = vmatprep.mubr.msk.bf16.mxu0 %vm3483_vm0, %v3481_v3  ;;  %3143 = vmatprep.mubr.msk.bf16.mxu1 %vm3483_vm0, %v3481_v3 }
 0x52e   : > { %3147 = vmatprep.subr.bf16.mxu0 %v3481_v3 }
 0x543   : > { %v1956_v34 = vpop.xlane.xlu0 %1955  ;;  %v1959_v27 = vpop.xlane.xlu1 %1958 }
 0x544   : > { %3320 = vrcp.f32 %v1956_v34 }
 0x545   : > { %3322 = vrcp.f32 %v1959_v27  ;;  %v3284_v27 = vld [vmem:[#allocation7 + $0x28] sm:$0xff]  }
 0x551   : > { %v3321_v35 = vpop.eup %3320 }
 0x552   : > { %v3323_v36 = vpop.eup %3322  ;;  %v1974_v38 = vmul.f32 %v3321_v35, %v3937_v18 }
 0x553   : > { %v1975_v40 = vmul.f32 %v3323_v36, %v3939_v19 }
 0x554   : > { %v1982_v41 = vpack.c.bf16 %v1974_v38, %v1974_v38 }
 0x555   : > { %v1983_v43 = vpack.c.bf16 %v1975_v40, %v1975_v40 }
 0x556   : > { %3138 = vmatmul.mubr.msk.bf16.vlgmr.msra.gmra.mxu0 %vm1887_vm2, %v1982_v41 }
 0x557   : > { %3144 = vmatmul.mubr.msk.bf16.vlgmr.msra.gmra.mxu1 %vm1887_vm2, %v1983_v43  ;;  %3163 = vmatprep.mubr.msk.bf16.mxu0 %vm3483_vm0, %v3481_v3 }
 0x558   : > { %3148 = vmatpush3.bf16.msra.mxu0 %v3282_v48 }
 0x559   : > { %3149 = vmatprep.subr.bf16.mxu0 %v3481_v3 }
 0x55c   : > { %3150 = vmatpush3.bf16.msra.mxu0 %v3283_v25 }
 0x55d   : > { %3151 = vmatprep.subr.bf16.mxu0 %v3481_v3 }
 0x560   : > { %3152 = vmatpush3.bf16.msra.mxu0 %v3284_v27 }
 0x561   : > { %3153 = vmatprep.subr.bf16.mxu0 %v3481_v3 }
 0x5a4   : > { %v2025_v45 = vpop.f32.mrf.mxu0 }
 0x5a6   : > { %v3103_v46 = vpop.f32.mrf.mxu0 }
 0x5a7   : > { %v3285_v46 = vld [vmem:[#allocation7 + $0x20] sm:$0xff]  }
 0x5a8   : > { %v2028_v49 = vpop.f32.mrf.mxu0  ;;  %3154 = vmatpush3.bf16.msra.mxu0 %v3285_v46 }
 0x5a9   : > { %3155 = vmatprep.subr.bf16.mxu0 %v3481_v3 }
 0x5aa   : > { %v3104_v50 = vpop.f32.mrf.mxu0 }
 0x5ab   : > { %v3286_v50 = vld [vmem:[#allocation7 + $0x18] sm:$0xff]  }
 0x5ac   : > { %3156 = vmatpush3.bf16.msra.mxu0 %v3286_v50 }
 0x5ad   : > { %3157 = vmatprep.subr.bf16.mxu0 %v3481_v3 }
 0x5be   : > { %v2071_v51 = vpop.f32.mrf.mxu1 }
 0x5c0   : > { %v3109_v52 = vpop.f32.mrf.mxu1 }
 0x5c2   : > { %v2074_v53 = vpop.f32.mrf.mxu1 }
 0x5c4   : > { %v3110_v54 = vpop.f32.mrf.mxu1 }
 0x5c5   : > { %v2117_v18 = vpop.f32.mrf.mxu0 }
 0x5c6   : > { %v2353_v56 = vcombine.low %v2025_v45, %v2117_v18  ;;  %v2354_v60 = vcombine.high %v2025_v45, %v2117_v18 }
 0x5c7   : > { %v3115_v39 = vpop.f32.mrf.mxu0 }
 0x5c8   : > { %v2361_v58 = vrot.slane %v2353_v56, %v3716_v2  ;;  %v2368_v59 = vrot.slane %v2354_v60, %v3716_v2 }
 0x5c9   : > { %v2120_v19 = vpop.f32.mrf.mxu0 }
 0x5cb   : > { %v3116_v55 = vpop.f32.mrf.mxu0 }
 0x5de   : > { %v2163_v61 = vpop.f32.mrf.mxu1 }
 0x5df   : > { %v2369_v62 = vcombine.low %v2071_v51, %v2163_v61  ;;  %v2370_v63 = vcombine.high %v2071_v51, %v2163_v61  ;;  %v3287_v51 = vld [vmem:[#allocation7 + $0x10] sm:$0xff]  }
 0x5e0   : > { %v3121_v0 = vpop.f32.mrf.mxu1  ;;  %3158 = vmatpush3.bf16.msra.mxu0 %v3287_v51 }
 0x5e1   : > { %v2377_v4 = vrot.slane %v2369_v62, %v3716_v2  ;;  %v2384_v5 = vrot.slane %v2370_v63, %v3716_v2  ;;  %3159 = vmatprep.subr.bf16.mxu0 %v3481_v3 }
 0x5e2   : > { %v2166_v6 = vpop.f32.mrf.mxu1 }
 0x5e3   : > { %v2417_v7 = vcombine.low %v2361_v58, %v2377_v4  ;;  %v2418_v44 = vcombine.high %v2361_v58, %v2377_v4  ;;  %v2433_v11 = vcombine.low %v2368_v59, %v2384_v5  ;;  %v2434_v37 = vcombine.high %v2368_v59, %v2384_v5 }
 0x5e4   : > { %v3122_v12 = vpop.f32.mrf.mxu1 }
 0x5e5   : > { %v2425_v13 = vrot.slane %v2417_v7, %v3719_v9  ;;  %v2432_v8 = vrot.slane %v2418_v44, %v3719_v9  ;;  %v2441_v14 = vrot.slane %v2433_v11, %v3719_v9  ;;  %v2448_v17 = vrot.slane %v2434_v37, %v3719_v9  ;;  %v3288_v11 = vld [vmem:[#allocation7 + $0x8] sm:$0xff]  }
 0x5e6   : > { %3160 = vmatpush3.bf16.msra.mxu0 %v3288_v11 }
 0x5e7   : > { %v2960_v20 = vcombine.low %v2425_v13, %v2432_v8  ;;  %v2962_v26 = vcombine.high %v2425_v13, %v2432_v8  ;;  %v2964_v21 = vcombine.low %v2441_v14, %v2448_v17  ;;  %v2966_v33 = vcombine.high %v2441_v14, %v2448_v17  ;;  %3161 = vmatprep.subr.bf16.mxu0 %v3481_v3 }
 0x5e9   : > { %v2497_v1 = vrot.slane %v2960_v20, %v3716_v2  ;;  %v2513_v22 = vrot.slane %v2962_v26, %v3716_v2  ;;  %v2529_v23 = vrot.slane %v2964_v21, %v3716_v2  ;;  %v2545_v24 = vrot.slane %v2966_v33, %v3716_v2 }
 0x5eb   : > { %v2209_v28 = vpop.f32.mrf.mxu0  ;;  %v2255_v29 = vpop.f32.mrf.mxu1  ;;  %v2554_v42 = vcombine.high %v2497_v1, %v2513_v22  ;;  %v2586_v57 = vcombine.high %v2529_v23, %v2545_v24  ;;  %v2553_v30 = vcombine.low %v2497_v1, %v2513_v22  ;;  %v2585_v31 = vcombine.low %v2529_v23, %v2545_v24  ;;  %v3289_v22 = vld [vmem:[#allocation7] sm:$0xff]  }
 0x5ec   : > { %3162 = vmatpush3.bf16.msra.mxu0 %v3289_v22 }
 0x5ed   : > { %v3127_v47 = vpop.f32.mrf.mxu0  ;;  %v3133_v32 = vpop.f32.mrf.mxu1  ;;  %v2568_v15 = vrot.slane %v2554_v42, %v3719_v9  ;;  %v2600_v16 = vrot.slane %v2586_v57, %v3719_v9  ;;  %v4018_v10 = vrot.slane %v2553_v30, %v3719_v9  ;;  %v4021_v34 = vrot.slane %v2585_v31, %v3719_v9 }
 0x5ef   : > { %v2212_v35 = vpop.f32.mrf.mxu0  ;;  %v2258_v36 = vpop.f32.mrf.mxu1  ;;  %v2619_v38 = vcombine.low %v2568_v15, %v2600_v16  ;;  %v2618_v40 = vcombine.high %v4018_v10, %v4021_v34  ;;  %v2617_v41 = vcombine.low %v4018_v10, %v4021_v34  ;;  %v2620_v49 = vcombine.high %v2568_v15, %v2600_v16 }
 0x5f1   : > { %2630 = vrot.lane.b32.xlu1 %v2619_v38, %s3490_s3  ;;  %2626 = vrot.lane.b32.xlu0 %v2618_v40, %s3486_s19  ;;  %v3128_v43 = vpop.f32.mrf.mxu0  ;;  %v3134_v45 = vpop.f32.mrf.mxu1  ;;  %s3408_s19 = sshll.u32 %s3493_s13, 4  ;;  %s3409_s19 = int_to_ptr.vmem [resolvable:$false] %s3408_s19 }
 0x5f2   : > { %p3411_p6 = scmp.lt.s32.totalorder %s4071_s22, %s3409_s19 }
 0x5f5   : > { %2634 = vrot.lane.b32.xlu0 %v2620_v49, %s3488_s21  ;;  %v2968_v49 = vld [vmem:[%s4118_s6] ss:$0 sm:$0xff] }
 0x616   : > { %v2301_v52 = vpop.f32.mrf.mxu0 }
 0x617   : > { %v2385_v53 = vcombine.low %v2209_v28, %v2301_v52  ;;  %v2386_v54 = vcombine.high %v2209_v28, %v2301_v52  ;;  %v2347_v18 = vpop.f32.mrf.mxu1 }
 0x618   : > { %v2401_v39 = vcombine.low %v2255_v29, %v2347_v18  ;;  %v2402_v19 = vcombine.high %v2255_v29, %v2347_v18  ;;  %v3139_v55 = vpop.f32.mrf.mxu0 }
 0x619   : > { %v2393_v56 = vrot.slane %v2385_v53, %v3716_v2  ;;  %v2400_v60 = vrot.slane %v2386_v54, %v3716_v2  ;;  %v3145_v61 = vpop.f32.mrf.mxu1 }
 0x61a   : > { %v2409_v62 = vrot.slane %v2401_v39, %v3716_v2  ;;  %v2416_v63 = vrot.slane %v2402_v19, %v3716_v2  ;;  %v2304_v0 = vpop.f32.mrf.mxu0 }
 0x61b   : > { %v2350_v58 = vpop.f32.mrf.mxu1 }
 0x61c   : > { %v2449_v59 = vcombine.low %v2393_v56, %v2409_v62  ;;  %v2450_v4 = vcombine.high %v2393_v56, %v2409_v62  ;;  %v2465_v5 = vcombine.low %v2400_v60, %v2416_v63  ;;  %v2466_v6 = vcombine.high %v2400_v60, %v2416_v63  ;;  %v3140_v7 = vpop.f32.mrf.mxu0 }
 0x61d   : > { %v3146_v44 = vpop.f32.mrf.mxu1 }
 0x61e   : > { %v2457_v37 = vrot.slane %v2449_v59, %v3719_v9  ;;  %v2464_v12 = vrot.slane %v2450_v4, %v3719_v9  ;;  %v2473_v13 = vrot.slane %v2465_v5, %v3719_v9  ;;  %v2480_v8 = vrot.slane %v2466_v6, %v3719_v9 }
 0x620   : > { %v2961_v14 = vcombine.low %v2457_v37, %v2464_v12  ;;  %v2963_v17 = vcombine.high %v2457_v37, %v2464_v12  ;;  %v2965_v20 = vcombine.low %v2473_v13, %v2480_v8  ;;  %v2967_v26 = vcombine.high %v2473_v13, %v2480_v8 }
 0x622   : > { %v2504_v21 = vrot.slane %v2961_v14, %v3716_v2  ;;  %v2520_v33 = vrot.slane %v2963_v17, %v3716_v2  ;;  %v2536_v48 = vrot.slane %v2965_v20, %v3716_v2  ;;  %v2552_v1 = vrot.slane %v2967_v26, %v3716_v2 }
 0x624   : > { %v2569_v23 = vcombine.low %v2504_v21, %v2520_v33  ;;  %v2601_v24 = vcombine.low %v2536_v48, %v2552_v1  ;;  %v2570_v25 = vcombine.high %v2504_v21, %v2520_v33  ;;  %v2602_v28 = vcombine.high %v2536_v48, %v2552_v1 }
 0x626   : > { %v2577_v29 = vrot.slane %v2569_v23, %v3719_v9  ;;  %v2609_v42 = vrot.slane %v2601_v24, %v3719_v9  ;;  %v2584_v30 = vrot.slane %v2570_v25, %v3719_v9  ;;  %v2616_v31 = vrot.slane %v2602_v28, %v3719_v9 }
 0x628   : > { %v2622_v57 = vcombine.high %v2577_v29, %v2609_v42  ;;  %v2621_v3 = vcombine.low %v2577_v29, %v2609_v42  ;;  %v2624_v2 = vcombine.high %v2584_v30, %v2616_v31  ;;  %v2623_v47 = vcombine.low %v2584_v30, %v2616_v31 }
 0x62a   : > { %2642 = vrot.lane.b32.xlu0 %v2622_v57, %s3484_s14  ;;  %2638 = vrot.lane.b32.xlu1 %v2621_v3, %s3489_s12  ;;  %s4069_s14 = scalar_lea.hbm %s4119_s7, %s2978_s9 }
 0x62e   : > { %2650 = vrot.lane.b32.xlu0 %v2624_v2, %s3485_s18  ;;  %2646 = vrot.lane.b32.xlu1 %v2623_v47, %s3487_s17  ;;  %s2780_s18 = scalar_lea.sflag [#allocation4], %s3652_s11  ;;  %s3410_s17 = scalar_lea.vmem %s3409_s19, 256 }
 0x62f   : > { %p3412_p12 = scmp.lt.s32.totalorder %s3410_s17, %s3404_s28 }
 0x631   : > { %p3413_p3 = por %p3412_p12, %p3411_p6 }
 0x633   : > { %p3414_p9 = pnand %p3413_p3, %p3407_p2 }
 0x663   : > { %v2627_v32 = vpop.permute.xlu0 %2626  ;;  %v2631_v16 = vpop.permute.xlu1 %2630 }
 0x664   : > { %v2653_v15 = vsel %vm1518_vm1, %v2617_v41, %v2627_v32 }
 0x665   : > { %v2655_v9 = vsel %vm2654_vm4, %v2653_v15, %v2631_v16 }
 0x667   : > { %v2635_v27 = vpop.permute.xlu0 %2634 }
 0x668   : > { %v2657_v35 = vsel %vm2656_vm5, %v2655_v9, %v2635_v27 }
 0x69c   : > { %v2643_v36 = vpop.permute.xlu0 %2642  ;;  %v2639_v38 = vpop.permute.xlu1 %2638 }
 0x69d   : > { %v2659_v40 = vsel %vm2658_vm6, %v2657_v35, %v2639_v38 }
 0x69e   : > { %v2661_v45 = vsel %vm2660_vm7, %v2659_v40, %v2643_v36 }
 0x6a0   : > { %v2651_v43 = vpop.permute.xlu0 %2650  ;;  %v2647_v10 = vpop.permute.xlu1 %2646 }
 0x6a1   : > { %v2663_v34 = vsel %vm2662_vm8, %v2661_v45, %v2647_v10 }
 0x6a2   : > { %v2665_v41 = vsel %vm2664_vm9, %v2663_v34, %v2651_v43 }
 0x6a3   : > { %v2666_v46 = vpack.c.bf16 %v2665_v41, %v2665_v41 }
 0x6a5   : > { %3164 = vmatmul.mubr.bf16.vlgmr.msra.gmra.mxu0 %v2666_v46 }
 0x765   : > { %v2772_v50 = vpop.f32.mrf.mxu0 }
 0x766   : > { %v2773_v51 = vadd.f32 %v2968_v49, %v2772_v50 }
 0x767   : > { %v3165_v52 = vpop.f32.mrf.mxu0 }
 0x768   : > { %2778 = vst [vmem:[%s322_s20] sm:$0xff] %v2773_v51 }
 0x769   : > { %v2775_v53 = vpop.f32.mrf.mxu0 }
 0x76a   : > { %3417 = shalt.err (!%p3414_p9)
}
 0x76b   : > { %s3418_s21 = scalar_lea.hbm %s4069_s14, 128  ;;  %s3422_s3 = scalar_lea.hbm %s4119_s7, 256 }
 0x76c   : > { %p3419_p13 = scmp.ne.s32.totalorder %s4069_s14, %s3418_s21  ;;  %p3423_p4 = scmp.lt.s32.totalorder %s4069_s14, %s4119_s7 }
 0x76d   : > { %p3424_p8 = scmp.lt.s32.totalorder %s3422_s3, %s3418_s21 }
 0x76e   : > { %p3420_p5 = pnand %p3419_p13, %p4139_p0 }
 0x76f   : > { %p3425_p7 = por %p3424_p8, %p3423_p4 }
 0x770   : > { %p3421_p10 = pneg %p3420_p5 }
 0x772   : > { %p3426_p11 = pnand %p3425_p7, %p3421_p10 }
 0x774   : > { %3429 = shalt.err (!%p3426_p11)
}
 0x775   : > { %3177 = dma.vmem_to_hbm [thread:$0]  (%p4139_p0), %s4071_s22, 128, %s4069_s14, %s2780_s18   ;;  %v3166_v54 = vpop.f32.mrf.mxu0 }
 0x776 PF: > { %s2805_s9 = sand.u32 1, %s3460_s24   ;;  %p4140_p1 = scmp.ne.s32.totalorder %s4127_s8, 0 }
 0x777   : > { %p4141_p2 = scmp.ge.s32.totalorder %s3472_s27, 2  ;;  %s2806_s20 = scalar_lea.sflag [#allocation4], %s2805_s9 }
 0x779   : > { %p3191_p6 = pnand %p4141_p2, %p4140_p1 }
 0x77b   : > { %p3192_p12 = pneg %p3191_p6 }
 0x77d   : > { %3455 = dma.done.wait (%p3192_p12), %s2806_s20, 128  }
 0x77e   : > { %3457 = vsyncadd (%p3192_p12), %s2806_s20, 4294967168  ;;  %p21_p3 = scmp.ge.s32.totalorder %s3606_s10, 4   ;;  %s4142_s24 = smov %s3464_s25 }
 0x77f   : > { %s4143_s25 = smov %s3468_s26  ;;  %s4144_s26 = smov %s3615_s15 }
 0x780   : > { %s4145_s27 = smov %s3606_s10  ;;  %23 = sbr.rel (!%p21_p3) target bundleno = 9 (0x9), region = 101 }
 0x785   :  { %2811 = vsyncpa [#allocation3], 1 }
 0x786   :  { %2813 = vsyncpa [#allocation3 + $0x1], 1 }
 0x787   :  { %2814 = vsyncpa [#allocation6], 1 }
 0x788   :  { %2815 = vsyncpa [#allocation4], 1 }
 0x789   :  { %2817 = vsyncpa [#allocation4 + $0x1], 1 }

</bundles_post_ra>
